<compile_context>
chip_gen: v6e
topology: v6e:2x2x1
jax: 0.10.0
libtpu: 0.0.40
codegen_flags: <defaults>
</compile_context>

<pallas_src>
import functools

import numpy as np
import jax
import jax.numpy as jnp
from jax.experimental import pallas as pl
from jax.experimental.pallas import tpu as pltpu


def _img_sum(x, bt):
    """Per-image sum: (Bt, R, 128) -> (Bt, 1, 1) (plain scalar when bt == 1)."""
    if bt == 1:
        return jnp.sum(x)
    return jnp.sum(x, axis=(1, 2), keepdims=True)


def _topk_sum(vals, k, *, bt):
    """Exact per-image sum of the k largest elements of `vals`.

    vals: (Bt, R, 128) f32 with values in {-1.0} U [0, +inf)  (-1 is a "never
    select" sentinel).  k: (Bt, 1, 1) f32 (scalar when bt == 1).  Images whose
    k exceeds their number of non-sentinel candidates produce a finite garbage
    value that callers must discard.

    The int32 bit pattern of a non-negative f32 is monotone in its value, so a
    binary search over the bit pattern finds the k-th largest value t exactly;
    ties at t are then handled exactly via
        sum = sum(v > t) + (k - count(v > t)) * t.
    The search retires 2 bits per pass (three independent counts per pass
    overlap), i.e. 16 serialized passes instead of 31.
    """
    keys = pltpu.bitcast(vals, jnp.int32)

    def count_ge(cand):
        return _img_sum(jnp.where(keys >= cand, 1.0, 0.0), bt)

    t = jnp.int32(0) if bt == 1 else jnp.zeros(k.shape, jnp.int32)

    # Bit 30 alone (bit 31 is the sign bit and must stay 0).
    c = t | jnp.int32(1 << 30)
    t = jnp.where(count_ge(c) >= k, c, t)
    # Remaining bits 29..0, two per pass.
    for b in range(28, -1, -2):
        c1 = t | jnp.int32(1 << b)
        c2 = t | jnp.int32(2 << b)
        c3 = t | jnp.int32(3 << b)
        n1, n2, n3 = count_ge(c1), count_ge(c2), count_ge(c3)
        t = jnp.where(n3 >= k, c3,
            jnp.where(n2 >= k, c2,
            jnp.where(n1 >= k, c1, t)))

    if bt == 1:
        # Scalar-valued t: recover the threshold with a masked max (at least one
        # element matches t; the 0.0 fallback only occurs in the discarded
        # k > #candidates case).
        thr = jnp.max(jnp.where(keys == t, vals, 0.0))
    else:
        thr = pltpu.bitcast(t, jnp.float32)   # exact k-th largest value

    gt = keys > t
    count_gt = _img_sum(jnp.where(gt, 1.0, 0.0), bt)
    sum_gt = _img_sum(jnp.where(gt, vals, 0.0), bt)
    return sum_gt + (k - count_gt) * thr


def maploss_kernel(gh_ref, p_ref, mask_ref, out_ref, *, n_valid, bt):
    gh = gh_ref[...]                               # (Bt, R, 128)
    diff = p_ref[...] - gh
    loss = diff * diff * mask_ref[...]             # MSE(none) * mask; padded pixels are exactly 0

    pos = gh >= 0.1                                # padded gh == 0 -> never positive
    pos_cnt = _img_sum(jnp.where(pos, 1.0, 0.0), bt)
    pos_sum = _img_sum(jnp.where(pos, loss, 0.0), bt)
    sum_loss = _img_sum(loss, bt)
    neg_sum = sum_loss - pos_sum                   # exact: padded loss == 0
    neg_cnt = jnp.float32(n_valid) - pos_cnt       # exact: static real-pixel count

    has_pos = pos_cnt > 0.0
    k_neg = 3.0 * pos_cnt
    needs_topk = jnp.logical_or(jnp.logical_not(has_pos), neg_cnt >= k_neg)

    pos_mean = pos_sum / jnp.maximum(pos_cnt, 1.0)
    # TODO(synk): when an image has positives but zero negatives, torch's
    # neg_vals.mean() would be NaN; here 0 is added instead (neg_cnt clamped to 1).
    neg_mean_all = neg_sum / jnp.maximum(neg_cnt, 1.0)
    base = jnp.where(has_pos, pos_mean, 0.0) + jnp.where(needs_topk, 0.0, neg_mean_all)

    if bt == 1:
        any_topk = needs_topk
    else:
        any_topk = jnp.sum(jnp.where(needs_topk, 1.0, 0.0)) > 0.0

    @pl.when(any_topk)
    def _():
        # Candidate set: negative pixels for images with positives, every pixel
        # otherwise.  Padded pixels carry a 0 loss, which provably cannot change
        # a valid top-k sum, so no explicit validity mask is required.
        sel = jnp.logical_or(jnp.logical_not(pos), jnp.logical_not(has_pos))
        rank = jnp.where(sel, loss, -1.0)          # losses >= 0, so -1 sinks non-candidates
        # TODO(synk): torch.topk(x, 500) raises when an image has < 500 pixels;
        # here k is clamped to the pixel count instead.
        k = jnp.where(has_pos, k_neg, jnp.float32(min(500, n_valid)))
        topk_mean = _topk_sum(rank, k, bt=bt) / k
        img = base + jnp.where(needs_topk, topk_mean, 0.0)
        out_ref[...] = jnp.broadcast_to(img, out_ref.shape).astype(jnp.float32)

    @pl.when(jnp.logical_not(any_topk))
    def _():
        out_ref[...] = jnp.broadcast_to(base, out_ref.shape).astype(jnp.float32)


def maploss(gh_label, p_gh, mask):
    """Forward pass of the PyTorch Maploss module (batch-mean OHEM heatmap loss)."""
    assert gh_label.shape == p_gh.shape == mask.shape
    B = int(gh_label.shape[0])
    P = int(np.prod(gh_label.shape[1:]))
    # Counts (and 3 * count) are carried in f32 inside the kernel; keep them exact.
    assert P <= (1 << 22), "per-image pixel count too large for exact f32 counting"
    P_pad = ((P + 127) // 128) * 128
    R = P_pad // 128

    per_img_in_bytes = R * 128 * 4                 # one f32 input block, one image
    # Images per grid step: keep 2 (double-buffer) x 3 inputs x Bt blocks within a
    # conservative 12 MiB (fits v7x's 64 MiB VMEM / 32 MiB default scoped budget),
    # and keep the grid >= 2 so both v7x TensorCores get work.
    bt_vmem = max(1, (12 << 20) // (6 * per_img_in_bytes))
    bt_cores = max(1, (B + 1) // 2)
    Bt = int(min(B, bt_vmem, bt_cores))
    # TODO(synk): heatmaps so large that a single double-buffered image exceeds
    # VMEM would additionally need pixel-axis tiling.

    def run(bt):
        bg = -(-B // bt)
        b_pad = bg * bt

        def prep(x):
            x = jnp.asarray(x, jnp.float32).reshape(B, -1)
            if b_pad != B or P_pad != P:
                x = jnp.pad(x, ((0, b_pad - B), (0, P_pad - P)))
            return x.reshape(b_pad, R, 128)

        kernel = functools.partial(maploss_kernel, n_valid=P, bt=bt)
        # Exact double-buffered footprint + headroom (right-sized for v7x).
        vmem_limit = int(max(
            8 << 20,
            6 * bt * per_img_in_bytes + 2 * bt * 128 * 4 + (4 << 20)))

        out = pl.pallas_call(
            kernel,
            out_shape=jax.ShapeDtypeStruct((b_pad, 1, 128), jnp.float32),
            grid=(bg,),
            in_specs=[pl.BlockSpec((bt, R, 128), lambda g: (g, 0, 0))] * 3,
            out_specs=pl.BlockSpec((bt, 1, 128), lambda g: (g, 0, 0)),
            compiler_params=pltpu.CompilerParams(
                dimension_semantics=("parallel",),
                vmem_limit_bytes=vmem_limit,
            ),
        )(prep(gh_label), prep(p_gh), prep(mask))
        # Batch-padded images are all-zero and contribute exactly 0.
        return jnp.sum(out[:, 0, 0]) / jnp.float32(B)

    if Bt == 1:
        return run(1)
    try:
        return run(Bt)
    except Exception:
        # Safety net: fall back to the per-image scalar-carry variant if the
        # batched (Bt > 1) reduction path ever fails to lower on this backend.
        return run(1)


def ref_maploss(gh_label, p_gh, mask):
    """NumPy re-implementation of the PyTorch module for verification."""
    gh = np.asarray(gh_label, np.float32)
    p = np.asarray(p_gh, np.float32)
    m = np.asarray(mask, np.float32)
    B = gh.shape[0]
    loss = ((p - gh) ** 2) * m
    lossf = loss.reshape(B, -1)
    ghf = gh.reshape(B, -1)
    s = 0.0
    for i in range(B):
        pre, lab = lossf[i], ghf[i]
        pos_vals = pre[lab >= 0.1]
        neg_vals = pre[lab < 0.1]
        if len(pos_vals) != 0:
            s += pos_vals.mean()
            if len(neg_vals) < 3 * len(pos_vals):
                s += neg_vals.mean()
            else:
                k = 3 * len(pos_vals)
                s += np.sort(neg_vals)[::-1][:k].mean()
        else:
            k = min(500, pre.size)
            s += np.sort(pre)[::-1][:k].mean()
    return np.float32(s / B)


def _check(gh_label, p_gh, mask):
    out = jax.block_until_ready(maploss(gh_label, p_gh, mask))
    ref = ref_maploss(gh_label, p_gh, mask)
    np.testing.assert_allclose(np.asarray(out), ref, rtol=1e-4, atol=1e-5)


if __name__ == "__main__":
    key = jax.random.PRNGKey(0)
    keys = jax.random.split(key, 10)
    B, H, W = 2, 16, 16

    p_gh = jax.random.uniform(keys[0], (B, H, W), jnp.float32)
    lab_mag = jax.random.uniform(keys[1], (B, H, W), jnp.float32)
    lab_sel = (jax.random.uniform(keys[2], (B, H, W)) < 0.15).astype(jnp.float32)
    gh_label = lab_mag * lab_sel                   # ~13% of pixels "positive"
    mask = (jax.random.uniform(keys[3], (B, H, W)) < 0.7).astype(jnp.float32)

    # Case 1: typical sparse-positive images (hard-negative top-k branch).
    _check(gh_label, p_gh, mask)

    # Case 2: no positive pixels at all (top-500-of-all branch).
    _check(jnp.zeros((B, H, W), jnp.float32), p_gh, mask)

    # Case 3: dense positives so that #neg < 3 * #pos (plain negative-mean
    # branch; the in-kernel gate skips the top-k search entirely here).
    lab_sel_dense = (jax.random.uniform(keys[4], (B, H, W)) < 0.6).astype(jnp.float32)
    gh_dense = jnp.maximum(lab_mag, 0.2) * lab_sel_dense
    _check(gh_dense, p_gh, mask)

    # Case 4: spatial size not a multiple of 128 pixels (pixel-padding path).
    Hs, Ws = 10, 10
    p2 = jax.random.uniform(keys[5], (B, Hs, Ws), jnp.float32)
    g2 = (lab_mag[:, :Hs, :Ws] * lab_sel[:, :Hs, :Ws]).astype(jnp.float32)
    m2 = mask[:, :Hs, :Ws]
    _check(g2, p2, m2)

    # Case 5: odd batch with mixed images (sparse-positive and no-positive in
    # the same block) -> exercises the batched (Bt > 1) vectorized carry,
    # batch padding and mixed branches within one grid step.
    B5 = 5
    p5 = jax.random.uniform(keys[6], (B5, H, W), jnp.float32)
    mag5 = jax.random.uniform(keys[7], (B5, H, W), jnp.float32)
    sel5 = (jax.random.uniform(keys[8], (B5, H, W)) < 0.15).astype(jnp.float32)
    g5 = (mag5 * sel5).at[2].set(0.0)              # image 2 has no positives
    m5 = (jax.random.uniform(keys[9], (B5, H, W)) < 0.7).astype(jnp.float32)
    _check(g5, p5, m5)

    print("KERNEL_OK")
</pallas_src>

<mosaic_0001>
module attributes {stable_mosaic.version = 11 : i64} {
  func.func @maploss_kernel(%arg0: i32, %arg1: memref<1x2x128xf32, #tpu.memory_space<vmem>>, %arg2: memref<1x2x128xf32, #tpu.memory_space<vmem>>, %arg3: memref<1x2x128xf32, #tpu.memory_space<vmem>>, %arg4: memref<1x1x128xf32, #tpu.memory_space<vmem>>) attributes {dimension_semantics = [#tpu.dimension_semantics<parallel>], iteration_bounds = array<i64: 2>, scalar_prefetch = 0 : i64, scratch_operands = 0 : i64, tpu.core_type = #tpu.core_type<tc>, window_params = [{transform_indices = @transform_0, window_bounds = array<i64: 1, 2, 128>}, {transform_indices = @transform_1, window_bounds = array<i64: 1, 2, 128>}, {transform_indices = @transform_2, window_bounds = array<i64: 1, 2, 128>}, {transform_indices = @transform_3, window_bounds = array<i64: 1, 1, 128>}]} {
    %c0 = arith.constant 0 : index
    %c0_0 = arith.constant 0 : index
    %c0_1 = arith.constant 0 : index
    %0 = vector.load %arg1[%c0, %c0_0, %c0_1] : memref<1x2x128xf32, #tpu.memory_space<vmem>>, vector<1x2x128xf32>
    %c0_2 = arith.constant 0 : index
    %c0_3 = arith.constant 0 : index
    %c0_4 = arith.constant 0 : index
    %1 = vector.load %arg2[%c0_2, %c0_3, %c0_4] : memref<1x2x128xf32, #tpu.memory_space<vmem>>, vector<1x2x128xf32>
    %2 = arith.subf %1, %0 : vector<1x2x128xf32>
    %3 = arith.mulf %2, %2 : vector<1x2x128xf32>
    %c0_5 = arith.constant 0 : index
    %c0_6 = arith.constant 0 : index
    %c0_7 = arith.constant 0 : index
    %4 = vector.load %arg3[%c0_5, %c0_6, %c0_7] : memref<1x2x128xf32, #tpu.memory_space<vmem>>, vector<1x2x128xf32>
    %5 = arith.mulf %3, %4 : vector<1x2x128xf32>
    %cst = arith.constant 1.000000e-01 : f32
    %6 = vector.broadcast %cst : f32 to vector<1x2x128xf32>
    %7 = arith.cmpf oge, %0, %6 : vector<1x2x128xf32>
    %cst_8 = arith.constant 1.000000e+00 : f32
    %cst_9 = arith.constant 0.000000e+00 : f32
    %8 = vector.broadcast %cst_8 : f32 to vector<1x2x128xf32>
    %9 = vector.broadcast %cst_9 : f32 to vector<1x2x128xf32>
    %10 = arith.select %7, %8, %9 : vector<1x2x128xi1>, vector<1x2x128xf32>
    %11 = vector.shape_cast %10 : vector<1x2x128xf32> to vector<1x1x2x128xf32>
    %cst_10 = arith.constant dense<0.000000e+00> : vector<1xf32>
    %12 = vector.multi_reduction <add>, %11, %cst_10 [1, 2, 3] : vector<1x1x2x128xf32> to vector<1xf32>
    %13 = vector.shape_cast %12 : vector<1xf32> to vector<1x1x1x1xf32>
    %14 = vector.extract %13[0, 0, 0, 0] : f32 from vector<1x1x1x1xf32>
    %cst_11 = arith.constant 0.000000e+00 : f32
    %15 = vector.broadcast %cst_11 : f32 to vector<1x2x128xf32>
    %16 = arith.select %7, %5, %15 : vector<1x2x128xi1>, vector<1x2x128xf32>
    %17 = vector.shape_cast %16 : vector<1x2x128xf32> to vector<1x1x2x128xf32>
    %cst_12 = arith.constant dense<0.000000e+00> : vector<1xf32>
    %18 = vector.multi_reduction <add>, %17, %cst_12 [1, 2, 3] : vector<1x1x2x128xf32> to vector<1xf32>
    %19 = vector.shape_cast %18 : vector<1xf32> to vector<1x1x1x1xf32>
    %20 = vector.extract %19[0, 0, 0, 0] : f32 from vector<1x1x1x1xf32>
    %21 = vector.shape_cast %5 : vector<1x2x128xf32> to vector<1x1x2x128xf32>
    %cst_13 = arith.constant dense<0.000000e+00> : vector<1xf32>
    %22 = vector.multi_reduction <add>, %21, %cst_13 [1, 2, 3] : vector<1x1x2x128xf32> to vector<1xf32>
    %23 = vector.shape_cast %22 : vector<1xf32> to vector<1x1x1x1xf32>
    %24 = vector.extract %23[0, 0, 0, 0] : f32 from vector<1x1x1x1xf32>
    %25 = arith.subf %24, %20 : f32
    %cst_14 = arith.constant 2.560000e+02 : f32
    %26 = arith.subf %cst_14, %14 : f32
    %cst_15 = arith.constant 0.000000e+00 : f32
    %27 = arith.cmpf ogt, %14, %cst_15 : f32
    %cst_16 = arith.constant 3.000000e+00 : f32
    %28 = arith.mulf %cst_16, %14 : f32
    %true = arith.constant true
    %29 = arith.xori %27, %true : i1
    %30 = arith.cmpf oge, %26, %28 : f32
    %31 = arith.ori %29, %30 : i1
    %cst_17 = arith.constant 1.000000e+00 : f32
    %32 = arith.maximumf %14, %cst_17 : f32
    %33 = arith.divf %20, %32 : f32
    %cst_18 = arith.constant 1.000000e+00 : f32
    %34 = arith.maximumf %26, %cst_18 : f32
    %35 = arith.divf %25, %34 : f32
    %cst_19 = arith.constant 0.000000e+00 : f32
    %36 = arith.select %27, %33, %cst_19 : f32
    %cst_20 = arith.constant 0.000000e+00 : f32
    %37 = arith.select %31, %cst_20, %35 : f32
    %38 = arith.addf %36, %37 : f32
    %39 = arith.extui %31 : i1 to i32
    %c0_i32 = arith.constant 0 : i32
    %40 = arith.cmpi ne, %39, %c0_i32 : i32
    scf.if %40 {
      %cst_23 = arith.constant dense<true> : vector<1x2x128xi1>
      %44 = arith.xori %7, %cst_23 : vector<1x2x128xi1>
      %true_24 = arith.constant true
      %45 = arith.xori %27, %true_24 : i1
      %46 = vector.broadcast %45 : i1 to vector<1x2x128xi1>
      %47 = arith.ori %44, %46 : vector<1x2x128xi1>
      %cst_25 = arith.constant -1.000000e+00 : f32
      %48 = vector.broadcast %cst_25 : f32 to vector<1x2x128xf32>
      %49 = arith.select %47, %5, %48 : vector<1x2x128xi1>, vector<1x2x128xf32>
      %cst_26 = arith.constant 2.560000e+02 : f32
      %50 = arith.select %27, %28, %cst_26 : f32
      %51 = tpu.bitcast %49 : vector<1x2x128xf32> -> vector<1x2x128xi32>
      %c0_i32_27 = arith.constant 0 : i32
      %c1073741824_i32 = arith.constant 1073741824 : i32
      %52 = arith.ori %c0_i32_27, %c1073741824_i32 : i32
      %53 = vector.broadcast %52 : i32 to vector<1x2x128xi32>
      %54 = arith.cmpi sge, %51, %53 : vector<1x2x128xi32>
      %cst_28 = arith.constant 1.000000e+00 : f32
      %cst_29 = arith.constant 0.000000e+00 : f32
      %55 = vector.broadcast %cst_28 : f32 to vector<1x2x128xf32>
      %56 = vector.broadcast %cst_29 : f32 to vector<1x2x128xf32>
      %57 = arith.select %54, %55, %56 : vector<1x2x128xi1>, vector<1x2x128xf32>
      %58 = vector.shape_cast %57 : vector<1x2x128xf32> to vector<1x1x2x128xf32>
      %cst_30 = arith.constant dense<0.000000e+00> : vector<1xf32>
      %59 = vector.multi_reduction <add>, %58, %cst_30 [1, 2, 3] : vector<1x1x2x128xf32> to vector<1xf32>
      %60 = vector.shape_cast %59 : vector<1xf32> to vector<1x1x1x1xf32>
      %61 = vector.extract %60[0, 0, 0, 0] : f32 from vector<1x1x1x1xf32>
      %62 = arith.cmpf oge, %61, %50 : f32
      %c0_i32_31 = arith.constant 0 : i32
      %63 = arith.select %62, %52, %c0_i32_31 : i32
      %c268435456_i32 = arith.constant 268435456 : i32
      %64 = arith.ori %63, %c268435456_i32 : i32
      %c536870912_i32 = arith.constant 536870912 : i32
      %65 = arith.ori %63, %c536870912_i32 : i32
      %c805306368_i32 = arith.constant 805306368 : i32
      %66 = arith.ori %63, %c805306368_i32 : i32
      %67 = vector.broadcast %64 : i32 to vector<1x2x128xi32>
      %68 = arith.cmpi sge, %51, %67 : vector<1x2x128xi32>
      %cst_32 = arith.constant 1.000000e+00 : f32
      %cst_33 = arith.constant 0.000000e+00 : f32
      %69 = vector.broadcast %cst_32 : f32 to vector<1x2x128xf32>
      %70 = vector.broadcast %cst_33 : f32 to vector<1x2x128xf32>
      %71 = arith.select %68, %69, %70 : vector<1x2x128xi1>, vector<1x2x128xf32>
      %72 = vector.shape_cast %71 : vector<1x2x128xf32> to vector<1x1x2x128xf32>
      %cst_34 = arith.constant dense<0.000000e+00> : vector<1xf32>
      %73 = vector.multi_reduction <add>, %72, %cst_34 [1, 2, 3] : vector<1x1x2x128xf32> to vector<1xf32>
      %74 = vector.shape_cast %73 : vector<1xf32> to vector<1x1x1x1xf32>
      %75 = vector.extract %74[0, 0, 0, 0] : f32 from vector<1x1x1x1xf32>
      %76 = vector.broadcast %65 : i32 to vector<1x2x128xi32>
      %77 = arith.cmpi sge, %51, %76 : vector<1x2x128xi32>
      %cst_35 = arith.constant 1.000000e+00 : f32
      %cst_36 = arith.constant 0.000000e+00 : f32
      %78 = vector.broadcast %cst_35 : f32 to vector<1x2x128xf32>
      %79 = vector.broadcast %cst_36 : f32 to vector<1x2x128xf32>
      %80 = arith.select %77, %78, %79 : vector<1x2x128xi1>, vector<1x2x128xf32>
      %81 = vector.shape_cast %80 : vector<1x2x128xf32> to vector<1x1x2x128xf32>
      %cst_37 = arith.constant dense<0.000000e+00> : vector<1xf32>
      %82 = vector.multi_reduction <add>, %81, %cst_37 [1, 2, 3] : vector<1x1x2x128xf32> to vector<1xf32>
      %83 = vector.shape_cast %82 : vector<1xf32> to vector<1x1x1x1xf32>
      %84 = vector.extract %83[0, 0, 0, 0] : f32 from vector<1x1x1x1xf32>
      %85 = vector.broadcast %66 : i32 to vector<1x2x128xi32>
      %86 = arith.cmpi sge, %51, %85 : vector<1x2x128xi32>
      %cst_38 = arith.constant 1.000000e+00 : f32
      %cst_39 = arith.constant 0.000000e+00 : f32
      %87 = vector.broadcast %cst_38 : f32 to vector<1x2x128xf32>
      %88 = vector.broadcast %cst_39 : f32 to vector<1x2x128xf32>
      %89 = arith.select %86, %87, %88 : vector<1x2x128xi1>, vector<1x2x128xf32>
      %90 = vector.shape_cast %89 : vector<1x2x128xf32> to vector<1x1x2x128xf32>
      %cst_40 = arith.constant dense<0.000000e+00> : vector<1xf32>
      %91 = vector.multi_reduction <add>, %90, %cst_40 [1, 2, 3] : vector<1x1x2x128xf32> to vector<1xf32>
      %92 = vector.shape_cast %91 : vector<1xf32> to vector<1x1x1x1xf32>
      %93 = vector.extract %92[0, 0, 0, 0] : f32 from vector<1x1x1x1xf32>
      %94 = arith.cmpf oge, %93, %50 : f32
      %95 = arith.cmpf oge, %84, %50 : f32
      %96 = arith.cmpf oge, %75, %50 : f32
      %97 = arith.select %96, %64, %63 : i32
      %98 = arith.select %95, %65, %97 : i32
      %99 = arith.select %94, %66, %98 : i32
      %c67108864_i32 = arith.constant 67108864 : i32
      %100 = arith.ori %99, %c67108864_i32 : i32
      %c134217728_i32 = arith.constant 134217728 : i32
      %101 = arith.ori %99, %c134217728_i32 : i32
      %c201326592_i32 = arith.constant 201326592 : i32
      %102 = arith.ori %99, %c201326592_i32 : i32
      %103 = vector.broadcast %100 : i32 to vector<1x2x128xi32>
      %104 = arith.cmpi sge, %51, %103 : vector<1x2x128xi32>
      %cst_41 = arith.constant 1.000000e+00 : f32
      %cst_42 = arith.constant 0.000000e+00 : f32
      %105 = vector.broadcast %cst_41 : f32 to vector<1x2x128xf32>
      %106 = vector.broadcast %cst_42 : f32 to vector<1x2x128xf32>
      %107 = arith.select %104, %105, %106 : vector<1x2x128xi1>, vector<1x2x128xf32>
      %108 = vector.shape_cast %107 : vector<1x2x128xf32> to vector<1x1x2x128xf32>
      %cst_43 = arith.constant dense<0.000000e+00> : vector<1xf32>
      %109 = vector.multi_reduction <add>, %108, %cst_43 [1, 2, 3] : vector<1x1x2x128xf32> to vector<1xf32>
      %110 = vector.shape_cast %109 : vector<1xf32> to vector<1x1x1x1xf32>
      %111 = vector.extract %110[0, 0, 0, 0] : f32 from vector<1x1x1x1xf32>
      %112 = vector.broadcast %101 : i32 to vector<1x2x128xi32>
      %113 = arith.cmpi sge, %51, %112 : vector<1x2x128xi32>
      %cst_44 = arith.constant 1.000000e+00 : f32
      %cst_45 = arith.constant 0.000000e+00 : f32
      %114 = vector.broadcast %cst_44 : f32 to vector<1x2x128xf32>
      %115 = vector.broadcast %cst_45 : f32 to vector<1x2x128xf32>
      %116 = arith.select %113, %114, %115 : vector<1x2x128xi1>, vector<1x2x128xf32>
      %117 = vector.shape_cast %116 : vector<1x2x128xf32> to vector<1x1x2x128xf32>
      %cst_46 = arith.constant dense<0.000000e+00> : vector<1xf32>
      %118 = vector.multi_reduction <add>, %117, %cst_46 [1, 2, 3] : vector<1x1x2x128xf32> to vector<1xf32>
      %119 = vector.shape_cast %118 : vector<1xf32> to vector<1x1x1x1xf32>
      %120 = vector.extract %119[0, 0, 0, 0] : f32 from vector<1x1x1x1xf32>
      %121 = vector.broadcast %102 : i32 to vector<1x2x128xi32>
      %122 = arith.cmpi sge, %51, %121 : vector<1x2x128xi32>
      %cst_47 = arith.constant 1.000000e+00 : f32
      %cst_48 = arith.constant 0.000000e+00 : f32
      %123 = vector.broadcast %cst_47 : f32 to vector<1x2x128xf32>
      %124 = vector.broadcast %cst_48 : f32 to vector<1x2x128xf32>
      %125 = arith.select %122, %123, %124 : vector<1x2x128xi1>, vector<1x2x128xf32>
      %126 = vector.shape_cast %125 : vector<1x2x128xf32> to vector<1x1x2x128xf32>
      %cst_49 = arith.constant dense<0.000000e+00> : vector<1xf32>
      %127 = vector.multi_reduction <add>, %126, %cst_49 [1, 2, 3] : vector<1x1x2x128xf32> to vector<1xf32>
      %128 = vector.shape_cast %127 : vector<1xf32> to vector<1x1x1x1xf32>
      %129 = vector.extract %128[0, 0, 0, 0] : f32 from vector<1x1x1x1xf32>
      %130 = arith.cmpf oge, %129, %50 : f32
      %131 = arith.cmpf oge, %120, %50 : f32
      %132 = arith.cmpf oge, %111, %50 : f32
      %133 = arith.select %132, %100, %99 : i32
      %134 = arith.select %131, %101, %133 : i32
      %135 = arith.select %130, %102, %134 : i32
      %c16777216_i32 = arith.constant 16777216 : i32
      %136 = arith.ori %135, %c16777216_i32 : i32
      %c33554432_i32 = arith.constant 33554432 : i32
      %137 = arith.ori %135, %c33554432_i32 : i32
      %c50331648_i32 = arith.constant 50331648 : i32
      %138 = arith.ori %135, %c50331648_i32 : i32
      %139 = vector.broadcast %136 : i32 to vector<1x2x128xi32>
      %140 = arith.cmpi sge, %51, %139 : vector<1x2x128xi32>
      %cst_50 = arith.constant 1.000000e+00 : f32
      %cst_51 = arith.constant 0.000000e+00 : f32
      %141 = vector.broadcast %cst_50 : f32 to vector<1x2x128xf32>
      %142 = vector.broadcast %cst_51 : f32 to vector<1x2x128xf32>
      %143 = arith.select %140, %141, %142 : vector<1x2x128xi1>, vector<1x2x128xf32>
      %144 = vector.shape_cast %143 : vector<1x2x128xf32> to vector<1x1x2x128xf32>
      %cst_52 = arith.constant dense<0.000000e+00> : vector<1xf32>
      %145 = vector.multi_reduction <add>, %144, %cst_52 [1, 2, 3] : vector<1x1x2x128xf32> to vector<1xf32>
      %146 = vector.shape_cast %145 : vector<1xf32> to vector<1x1x1x1xf32>
      %147 = vector.extract %146[0, 0, 0, 0] : f32 from vector<1x1x1x1xf32>
      %148 = vector.broadcast %137 : i32 to vector<1x2x128xi32>
      %149 = arith.cmpi sge, %51, %148 : vector<1x2x128xi32>
      %cst_53 = arith.constant 1.000000e+00 : f32
      %cst_54 = arith.constant 0.000000e+00 : f32
      %150 = vector.broadcast %cst_53 : f32 to vector<1x2x128xf32>
      %151 = vector.broadcast %cst_54 : f32 to vector<1x2x128xf32>
      %152 = arith.select %149, %150, %151 : vector<1x2x128xi1>, vector<1x2x128xf32>
      %153 = vector.shape_cast %152 : vector<1x2x128xf32> to vector<1x1x2x128xf32>
      %cst_55 = arith.constant dense<0.000000e+00> : vector<1xf32>
      %154 = vector.multi_reduction <add>, %153, %cst_55 [1, 2, 3] : vector<1x1x2x128xf32> to vector<1xf32>
      %155 = vector.shape_cast %154 : vector<1xf32> to vector<1x1x1x1xf32>
      %156 = vector.extract %155[0, 0, 0, 0] : f32 from vector<1x1x1x1xf32>
      %157 = vector.broadcast %138 : i32 to vector<1x2x128xi32>
      %158 = arith.cmpi sge, %51, %157 : vector<1x2x128xi32>
      %cst_56 = arith.constant 1.000000e+00 : f32
      %cst_57 = arith.constant 0.000000e+00 : f32
      %159 = vector.broadcast %cst_56 : f32 to vector<1x2x128xf32>
      %160 = vector.broadcast %cst_57 : f32 to vector<1x2x128xf32>
      %161 = arith.select %158, %159, %160 : vector<1x2x128xi1>, vector<1x2x128xf32>
      %162 = vector.shape_cast %161 : vector<1x2x128xf32> to vector<1x1x2x128xf32>
      %cst_58 = arith.constant dense<0.000000e+00> : vector<1xf32>
      %163 = vector.multi_reduction <add>, %162, %cst_58 [1, 2, 3] : vector<1x1x2x128xf32> to vector<1xf32>
      %164 = vector.shape_cast %163 : vector<1xf32> to vector<1x1x1x1xf32>
      %165 = vector.extract %164[0, 0, 0, 0] : f32 from vector<1x1x1x1xf32>
      %166 = arith.cmpf oge, %165, %50 : f32
      %167 = arith.cmpf oge, %156, %50 : f32
      %168 = arith.cmpf oge, %147, %50 : f32
      %169 = arith.select %168, %136, %135 : i32
      %170 = arith.select %167, %137, %169 : i32
      %171 = arith.select %166, %138, %170 : i32
      %c4194304_i32 = arith.constant 4194304 : i32
      %172 = arith.ori %171, %c4194304_i32 : i32
      %c8388608_i32 = arith.constant 8388608 : i32
      %173 = arith.ori %171, %c8388608_i32 : i32
      %c12582912_i32 = arith.constant 12582912 : i32
      %174 = arith.ori %171, %c12582912_i32 : i32
      %175 = vector.broadcast %172 : i32 to vector<1x2x128xi32>
      %176 = arith.cmpi sge, %51, %175 : vector<1x2x128xi32>
      %cst_59 = arith.constant 1.000000e+00 : f32
      %cst_60 = arith.constant 0.000000e+00 : f32
      %177 = vector.broadcast %cst_59 : f32 to vector<1x2x128xf32>
      %178 = vector.broadcast %cst_60 : f32 to vector<1x2x128xf32>
      %179 = arith.select %176, %177, %178 : vector<1x2x128xi1>, vector<1x2x128xf32>
      %180 = vector.shape_cast %179 : vector<1x2x128xf32> to vector<1x1x2x128xf32>
      %cst_61 = arith.constant dense<0.000000e+00> : vector<1xf32>
      %181 = vector.multi_reduction <add>, %180, %cst_61 [1, 2, 3] : vector<1x1x2x128xf32> to vector<1xf32>
      %182 = vector.shape_cast %181 : vector<1xf32> to vector<1x1x1x1xf32>
      %183 = vector.extract %182[0, 0, 0, 0] : f32 from vector<1x1x1x1xf32>
      %184 = vector.broadcast %173 : i32 to vector<1x2x128xi32>
      %185 = arith.cmpi sge, %51, %184 : vector<1x2x128xi32>
      %cst_62 = arith.constant 1.000000e+00 : f32
      %cst_63 = arith.constant 0.000000e+00 : f32
      %186 = vector.broadcast %cst_62 : f32 to vector<1x2x128xf32>
      %187 = vector.broadcast %cst_63 : f32 to vector<1x2x128xf32>
      %188 = arith.select %185, %186, %187 : vector<1x2x128xi1>, vector<1x2x128xf32>
      %189 = vector.shape_cast %188 : vector<1x2x128xf32> to vector<1x1x2x128xf32>
      %cst_64 = arith.constant dense<0.000000e+00> : vector<1xf32>
      %190 = vector.multi_reduction <add>, %189, %cst_64 [1, 2, 3] : vector<1x1x2x128xf32> to vector<1xf32>
      %191 = vector.shape_cast %190 : vector<1xf32> to vector<1x1x1x1xf32>
      %192 = vector.extract %191[0, 0, 0, 0] : f32 from vector<1x1x1x1xf32>
      %193 = vector.broadcast %174 : i32 to vector<1x2x128xi32>
      %194 = arith.cmpi sge, %51, %193 : vector<1x2x128xi32>
      %cst_65 = arith.constant 1.000000e+00 : f32
      %cst_66 = arith.constant 0.000000e+00 : f32
      %195 = vector.broadcast %cst_65 : f32 to vector<1x2x128xf32>
      %196 = vector.broadcast %cst_66 : f32 to vector<1x2x128xf32>
      %197 = arith.select %194, %195, %196 : vector<1x2x128xi1>, vector<1x2x128xf32>
      %198 = vector.shape_cast %197 : vector<1x2x128xf32> to vector<1x1x2x128xf32>
      %cst_67 = arith.constant dense<0.000000e+00> : vector<1xf32>
      %199 = vector.multi_reduction <add>, %198, %cst_67 [1, 2, 3] : vector<1x1x2x128xf32> to vector<1xf32>
      %200 = vector.shape_cast %199 : vector<1xf32> to vector<1x1x1x1xf32>
      %201 = vector.extract %200[0, 0, 0, 0] : f32 from vector<1x1x1x1xf32>
      %202 = arith.cmpf oge, %201, %50 : f32
      %203 = arith.cmpf oge, %192, %50 : f32
      %204 = arith.cmpf oge, %183, %50 : f32
      %205 = arith.select %204, %172, %171 : i32
      %206 = arith.select %203, %173, %205 : i32
      %207 = arith.select %202, %174, %206 : i32
      %c1048576_i32 = arith.constant 1048576 : i32
      %208 = arith.ori %207, %c1048576_i32 : i32
      %c2097152_i32 = arith.constant 2097152 : i32
      %209 = arith.ori %207, %c2097152_i32 : i32
      %c3145728_i32 = arith.constant 3145728 : i32
      %210 = arith.ori %207, %c3145728_i32 : i32
      %211 = vector.broadcast %208 : i32 to vector<1x2x128xi32>
      %212 = arith.cmpi sge, %51, %211 : vector<1x2x128xi32>
      %cst_68 = arith.constant 1.000000e+00 : f32
      %cst_69 = arith.constant 0.000000e+00 : f32
      %213 = vector.broadcast %cst_68 : f32 to vector<1x2x128xf32>
      %214 = vector.broadcast %cst_69 : f32 to vector<1x2x128xf32>
      %215 = arith.select %212, %213, %214 : vector<1x2x128xi1>, vector<1x2x128xf32>
      %216 = vector.shape_cast %215 : vector<1x2x128xf32> to vector<1x1x2x128xf32>
      %cst_70 = arith.constant dense<0.000000e+00> : vector<1xf32>
      %217 = vector.multi_reduction <add>, %216, %cst_70 [1, 2, 3] : vector<1x1x2x128xf32> to vector<1xf32>
      %218 = vector.shape_cast %217 : vector<1xf32> to vector<1x1x1x1xf32>
      %219 = vector.extract %218[0, 0, 0, 0] : f32 from vector<1x1x1x1xf32>
      %220 = vector.broadcast %209 : i32 to vector<1x2x128xi32>
      %221 = arith.cmpi sge, %51, %220 : vector<1x2x128xi32>
      %cst_71 = arith.constant 1.000000e+00 : f32
      %cst_72 = arith.constant 0.000000e+00 : f32
      %222 = vector.broadcast %cst_71 : f32 to vector<1x2x128xf32>
      %223 = vector.broadcast %cst_72 : f32 to vector<1x2x128xf32>
      %224 = arith.select %221, %222, %223 : vector<1x2x128xi1>, vector<1x2x128xf32>
      %225 = vector.shape_cast %224 : vector<1x2x128xf32> to vector<1x1x2x128xf32>
      %cst_73 = arith.constant dense<0.000000e+00> : vector<1xf32>
      %226 = vector.multi_reduction <add>, %225, %cst_73 [1, 2, 3] : vector<1x1x2x128xf32> to vector<1xf32>
      %227 = vector.shape_cast %226 : vector<1xf32> to vector<1x1x1x1xf32>
      %228 = vector.extract %227[0, 0, 0, 0] : f32 from vector<1x1x1x1xf32>
      %229 = vector.broadcast %210 : i32 to vector<1x2x128xi32>
      %230 = arith.cmpi sge, %51, %229 : vector<1x2x128xi32>
      %cst_74 = arith.constant 1.000000e+00 : f32
      %cst_75 = arith.constant 0.000000e+00 : f32
      %231 = vector.broadcast %cst_74 : f32 to vector<1x2x128xf32>
      %232 = vector.broadcast %cst_75 : f32 to vector<1x2x128xf32>
      %233 = arith.select %230, %231, %232 : vector<1x2x128xi1>, vector<1x2x128xf32>
      %234 = vector.shape_cast %233 : vector<1x2x128xf32> to vector<1x1x2x128xf32>
      %cst_76 = arith.constant dense<0.000000e+00> : vector<1xf32>
      %235 = vector.multi_reduction <add>, %234, %cst_76 [1, 2, 3] : vector<1x1x2x128xf32> to vector<1xf32>
      %236 = vector.shape_cast %235 : vector<1xf32> to vector<1x1x1x1xf32>
      %237 = vector.extract %236[0, 0, 0, 0] : f32 from vector<1x1x1x1xf32>
      %238 = arith.cmpf oge, %237, %50 : f32
      %239 = arith.cmpf oge, %228, %50 : f32
      %240 = arith.cmpf oge, %219, %50 : f32
      %241 = arith.select %240, %208, %207 : i32
      %242 = arith.select %239, %209, %241 : i32
      %243 = arith.select %238, %210, %242 : i32
      %c262144_i32 = arith.constant 262144 : i32
      %244 = arith.ori %243, %c262144_i32 : i32
      %c524288_i32 = arith.constant 524288 : i32
      %245 = arith.ori %243, %c524288_i32 : i32
      %c786432_i32 = arith.constant 786432 : i32
      %246 = arith.ori %243, %c786432_i32 : i32
      %247 = vector.broadcast %244 : i32 to vector<1x2x128xi32>
      %248 = arith.cmpi sge, %51, %247 : vector<1x2x128xi32>
      %cst_77 = arith.constant 1.000000e+00 : f32
      %cst_78 = arith.constant 0.000000e+00 : f32
      %249 = vector.broadcast %cst_77 : f32 to vector<1x2x128xf32>
      %250 = vector.broadcast %cst_78 : f32 to vector<1x2x128xf32>
      %251 = arith.select %248, %249, %250 : vector<1x2x128xi1>, vector<1x2x128xf32>
      %252 = vector.shape_cast %251 : vector<1x2x128xf32> to vector<1x1x2x128xf32>
      %cst_79 = arith.constant dense<0.000000e+00> : vector<1xf32>
      %253 = vector.multi_reduction <add>, %252, %cst_79 [1, 2, 3] : vector<1x1x2x128xf32> to vector<1xf32>
      %254 = vector.shape_cast %253 : vector<1xf32> to vector<1x1x1x1xf32>
      %255 = vector.extract %254[0, 0, 0, 0] : f32 from vector<1x1x1x1xf32>
      %256 = vector.broadcast %245 : i32 to vector<1x2x128xi32>
      %257 = arith.cmpi sge, %51, %256 : vector<1x2x128xi32>
      %cst_80 = arith.constant 1.000000e+00 : f32
      %cst_81 = arith.constant 0.000000e+00 : f32
      %258 = vector.broadcast %cst_80 : f32 to vector<1x2x128xf32>
      %259 = vector.broadcast %cst_81 : f32 to vector<1x2x128xf32>
      %260 = arith.select %257, %258, %259 : vector<1x2x128xi1>, vector<1x2x128xf32>
      %261 = vector.shape_cast %260 : vector<1x2x128xf32> to vector<1x1x2x128xf32>
      %cst_82 = arith.constant dense<0.000000e+00> : vector<1xf32>
      %262 = vector.multi_reduction <add>, %261, %cst_82 [1, 2, 3] : vector<1x1x2x128xf32> to vector<1xf32>
      %263 = vector.shape_cast %262 : vector<1xf32> to vector<1x1x1x1xf32>
      %264 = vector.extract %263[0, 0, 0, 0] : f32 from vector<1x1x1x1xf32>
      %265 = vector.broadcast %246 : i32 to vector<1x2x128xi32>
      %266 = arith.cmpi sge, %51, %265 : vector<1x2x128xi32>
      %cst_83 = arith.constant 1.000000e+00 : f32
      %cst_84 = arith.constant 0.000000e+00 : f32
      %267 = vector.broadcast %cst_83 : f32 to vector<1x2x128xf32>
      %268 = vector.broadcast %cst_84 : f32 to vector<1x2x128xf32>
      %269 = arith.select %266, %267, %268 : vector<1x2x128xi1>, vector<1x2x128xf32>
      %270 = vector.shape_cast %269 : vector<1x2x128xf32> to vector<1x1x2x128xf32>
      %cst_85 = arith.constant dense<0.000000e+00> : vector<1xf32>
      %271 = vector.multi_reduction <add>, %270, %cst_85 [1, 2, 3] : vector<1x1x2x128xf32> to vector<1xf32>
      %272 = vector.shape_cast %271 : vector<1xf32> to vector<1x1x1x1xf32>
      %273 = vector.extract %272[0, 0, 0, 0] : f32 from vector<1x1x1x1xf32>
      %274 = arith.cmpf oge, %273, %50 : f32
      %275 = arith.cmpf oge, %264, %50 : f32
      %276 = arith.cmpf oge, %255, %50 : f32
      %277 = arith.select %276, %244, %243 : i32
      %278 = arith.select %275, %245, %277 : i32
      %279 = arith.select %274, %246, %278 : i32
      %c65536_i32 = arith.constant 65536 : i32
      %280 = arith.ori %279, %c65536_i32 : i32
      %c131072_i32 = arith.constant 131072 : i32
      %281 = arith.ori %279, %c131072_i32 : i32
      %c196608_i32 = arith.constant 196608 : i32
      %282 = arith.ori %279, %c196608_i32 : i32
      %283 = vector.broadcast %280 : i32 to vector<1x2x128xi32>
      %284 = arith.cmpi sge, %51, %283 : vector<1x2x128xi32>
      %cst_86 = arith.constant 1.000000e+00 : f32
      %cst_87 = arith.constant 0.000000e+00 : f32
      %285 = vector.broadcast %cst_86 : f32 to vector<1x2x128xf32>
      %286 = vector.broadcast %cst_87 : f32 to vector<1x2x128xf32>
      %287 = arith.select %284, %285, %286 : vector<1x2x128xi1>, vector<1x2x128xf32>
      %288 = vector.shape_cast %287 : vector<1x2x128xf32> to vector<1x1x2x128xf32>
      %cst_88 = arith.constant dense<0.000000e+00> : vector<1xf32>
      %289 = vector.multi_reduction <add>, %288, %cst_88 [1, 2, 3] : vector<1x1x2x128xf32> to vector<1xf32>
      %290 = vector.shape_cast %289 : vector<1xf32> to vector<1x1x1x1xf32>
      %291 = vector.extract %290[0, 0, 0, 0] : f32 from vector<1x1x1x1xf32>
      %292 = vector.broadcast %281 : i32 to vector<1x2x128xi32>
      %293 = arith.cmpi sge, %51, %292 : vector<1x2x128xi32>
      %cst_89 = arith.constant 1.000000e+00 : f32
      %cst_90 = arith.constant 0.000000e+00 : f32
      %294 = vector.broadcast %cst_89 : f32 to vector<1x2x128xf32>
      %295 = vector.broadcast %cst_90 : f32 to vector<1x2x128xf32>
      %296 = arith.select %293, %294, %295 : vector<1x2x128xi1>, vector<1x2x128xf32>
      %297 = vector.shape_cast %296 : vector<1x2x128xf32> to vector<1x1x2x128xf32>
      %cst_91 = arith.constant dense<0.000000e+00> : vector<1xf32>
      %298 = vector.multi_reduction <add>, %297, %cst_91 [1, 2, 3] : vector<1x1x2x128xf32> to vector<1xf32>
      %299 = vector.shape_cast %298 : vector<1xf32> to vector<1x1x1x1xf32>
      %300 = vector.extract %299[0, 0, 0, 0] : f32 from vector<1x1x1x1xf32>
      %301 = vector.broadcast %282 : i32 to vector<1x2x128xi32>
      %302 = arith.cmpi sge, %51, %301 : vector<1x2x128xi32>
      %cst_92 = arith.constant 1.000000e+00 : f32
      %cst_93 = arith.constant 0.000000e+00 : f32
      %303 = vector.broadcast %cst_92 : f32 to vector<1x2x128xf32>
      %304 = vector.broadcast %cst_93 : f32 to vector<1x2x128xf32>
      %305 = arith.select %302, %303, %304 : vector<1x2x128xi1>, vector<1x2x128xf32>
      %306 = vector.shape_cast %305 : vector<1x2x128xf32> to vector<1x1x2x128xf32>
      %cst_94 = arith.constant dense<0.000000e+00> : vector<1xf32>
      %307 = vector.multi_reduction <add>, %306, %cst_94 [1, 2, 3] : vector<1x1x2x128xf32> to vector<1xf32>
      %308 = vector.shape_cast %307 : vector<1xf32> to vector<1x1x1x1xf32>
      %309 = vector.extract %308[0, 0, 0, 0] : f32 from vector<1x1x1x1xf32>
      %310 = arith.cmpf oge, %309, %50 : f32
      %311 = arith.cmpf oge, %300, %50 : f32
      %312 = arith.cmpf oge, %291, %50 : f32
      %313 = arith.select %312, %280, %279 : i32
      %314 = arith.select %311, %281, %313 : i32
      %315 = arith.select %310, %282, %314 : i32
      %c16384_i32 = arith.constant 16384 : i32
      %316 = arith.ori %315, %c16384_i32 : i32
      %c32768_i32 = arith.constant 32768 : i32
      %317 = arith.ori %315, %c32768_i32 : i32
      %c49152_i32 = arith.constant 49152 : i32
      %318 = arith.ori %315, %c49152_i32 : i32
      %319 = vector.broadcast %316 : i32 to vector<1x2x128xi32>
      %320 = arith.cmpi sge, %51, %319 : vector<1x2x128xi32>
      %cst_95 = arith.constant 1.000000e+00 : f32
      %cst_96 = arith.constant 0.000000e+00 : f32
      %321 = vector.broadcast %cst_95 : f32 to vector<1x2x128xf32>
      %322 = vector.broadcast %cst_96 : f32 to vector<1x2x128xf32>
      %323 = arith.select %320, %321, %322 : vector<1x2x128xi1>, vector<1x2x128xf32>
      %324 = vector.shape_cast %323 : vector<1x2x128xf32> to vector<1x1x2x128xf32>
      %cst_97 = arith.constant dense<0.000000e+00> : vector<1xf32>
      %325 = vector.multi_reduction <add>, %324, %cst_97 [1, 2, 3] : vector<1x1x2x128xf32> to vector<1xf32>
      %326 = vector.shape_cast %325 : vector<1xf32> to vector<1x1x1x1xf32>
      %327 = vector.extract %326[0, 0, 0, 0] : f32 from vector<1x1x1x1xf32>
      %328 = vector.broadcast %317 : i32 to vector<1x2x128xi32>
      %329 = arith.cmpi sge, %51, %328 : vector<1x2x128xi32>
      %cst_98 = arith.constant 1.000000e+00 : f32
      %cst_99 = arith.constant 0.000000e+00 : f32
      %330 = vector.broadcast %cst_98 : f32 to vector<1x2x128xf32>
      %331 = vector.broadcast %cst_99 : f32 to vector<1x2x128xf32>
      %332 = arith.select %329, %330, %331 : vector<1x2x128xi1>, vector<1x2x128xf32>
      %333 = vector.shape_cast %332 : vector<1x2x128xf32> to vector<1x1x2x128xf32>
      %cst_100 = arith.constant dense<0.000000e+00> : vector<1xf32>
      %334 = vector.multi_reduction <add>, %333, %cst_100 [1, 2, 3] : vector<1x1x2x128xf32> to vector<1xf32>
      %335 = vector.shape_cast %334 : vector<1xf32> to vector<1x1x1x1xf32>
      %336 = vector.extract %335[0, 0, 0, 0] : f32 from vector<1x1x1x1xf32>
      %337 = vector.broadcast %318 : i32 to vector<1x2x128xi32>
      %338 = arith.cmpi sge, %51, %337 : vector<1x2x128xi32>
      %cst_101 = arith.constant 1.000000e+00 : f32
      %cst_102 = arith.constant 0.000000e+00 : f32
      %339 = vector.broadcast %cst_101 : f32 to vector<1x2x128xf32>
      %340 = vector.broadcast %cst_102 : f32 to vector<1x2x128xf32>
      %341 = arith.select %338, %339, %340 : vector<1x2x128xi1>, vector<1x2x128xf32>
      %342 = vector.shape_cast %341 : vector<1x2x128xf32> to vector<1x1x2x128xf32>
      %cst_103 = arith.constant dense<0.000000e+00> : vector<1xf32>
      %343 = vector.multi_reduction <add>, %342, %cst_103 [1, 2, 3] : vector<1x1x2x128xf32> to vector<1xf32>
      %344 = vector.shape_cast %343 : vector<1xf32> to vector<1x1x1x1xf32>
      %345 = vector.extract %344[0, 0, 0, 0] : f32 from vector<1x1x1x1xf32>
      %346 = arith.cmpf oge, %345, %50 : f32
      %347 = arith.cmpf oge, %336, %50 : f32
      %348 = arith.cmpf oge, %327, %50 : f32
      %349 = arith.select %348, %316, %315 : i32
      %350 = arith.select %347, %317, %349 : i32
      %351 = arith.select %346, %318, %350 : i32
      %c4096_i32 = arith.constant 4096 : i32
      %352 = arith.ori %351, %c4096_i32 : i32
      %c8192_i32 = arith.constant 8192 : i32
      %353 = arith.ori %351, %c8192_i32 : i32
      %c12288_i32 = arith.constant 12288 : i32
      %354 = arith.ori %351, %c12288_i32 : i32
      %355 = vector.broadcast %352 : i32 to vector<1x2x128xi32>
      %356 = arith.cmpi sge, %51, %355 : vector<1x2x128xi32>
      %cst_104 = arith.constant 1.000000e+00 : f32
      %cst_105 = arith.constant 0.000000e+00 : f32
      %357 = vector.broadcast %cst_104 : f32 to vector<1x2x128xf32>
      %358 = vector.broadcast %cst_105 : f32 to vector<1x2x128xf32>
      %359 = arith.select %356, %357, %358 : vector<1x2x128xi1>, vector<1x2x128xf32>
      %360 = vector.shape_cast %359 : vector<1x2x128xf32> to vector<1x1x2x128xf32>
      %cst_106 = arith.constant dense<0.000000e+00> : vector<1xf32>
      %361 = vector.multi_reduction <add>, %360, %cst_106 [1, 2, 3] : vector<1x1x2x128xf32> to vector<1xf32>
      %362 = vector.shape_cast %361 : vector<1xf32> to vector<1x1x1x1xf32>
      %363 = vector.extract %362[0, 0, 0, 0] : f32 from vector<1x1x1x1xf32>
      %364 = vector.broadcast %353 : i32 to vector<1x2x128xi32>
      %365 = arith.cmpi sge, %51, %364 : vector<1x2x128xi32>
      %cst_107 = arith.constant 1.000000e+00 : f32
      %cst_108 = arith.constant 0.000000e+00 : f32
      %366 = vector.broadcast %cst_107 : f32 to vector<1x2x128xf32>
      %367 = vector.broadcast %cst_108 : f32 to vector<1x2x128xf32>
      %368 = arith.select %365, %366, %367 : vector<1x2x128xi1>, vector<1x2x128xf32>
      %369 = vector.shape_cast %368 : vector<1x2x128xf32> to vector<1x1x2x128xf32>
      %cst_109 = arith.constant dense<0.000000e+00> : vector<1xf32>
      %370 = vector.multi_reduction <add>, %369, %cst_109 [1, 2, 3] : vector<1x1x2x128xf32> to vector<1xf32>
      %371 = vector.shape_cast %370 : vector<1xf32> to vector<1x1x1x1xf32>
      %372 = vector.extract %371[0, 0, 0, 0] : f32 from vector<1x1x1x1xf32>
      %373 = vector.broadcast %354 : i32 to vector<1x2x128xi32>
      %374 = arith.cmpi sge, %51, %373 : vector<1x2x128xi32>
      %cst_110 = arith.constant 1.000000e+00 : f32
      %cst_111 = arith.constant 0.000000e+00 : f32
      %375 = vector.broadcast %cst_110 : f32 to vector<1x2x128xf32>
      %376 = vector.broadcast %cst_111 : f32 to vector<1x2x128xf32>
      %377 = arith.select %374, %375, %376 : vector<1x2x128xi1>, vector<1x2x128xf32>
      %378 = vector.shape_cast %377 : vector<1x2x128xf32> to vector<1x1x2x128xf32>
      %cst_112 = arith.constant dense<0.000000e+00> : vector<1xf32>
      %379 = vector.multi_reduction <add>, %378, %cst_112 [1, 2, 3] : vector<1x1x2x128xf32> to vector<1xf32>
      %380 = vector.shape_cast %379 : vector<1xf32> to vector<1x1x1x1xf32>
      %381 = vector.extract %380[0, 0, 0, 0] : f32 from vector<1x1x1x1xf32>
      %382 = arith.cmpf oge, %381, %50 : f32
      %383 = arith.cmpf oge, %372, %50 : f32
      %384 = arith.cmpf oge, %363, %50 : f32
      %385 = arith.select %384, %352, %351 : i32
      %386 = arith.select %383, %353, %385 : i32
      %387 = arith.select %382, %354, %386 : i32
      %c1024_i32 = arith.constant 1024 : i32
      %388 = arith.ori %387, %c1024_i32 : i32
      %c2048_i32 = arith.constant 2048 : i32
      %389 = arith.ori %387, %c2048_i32 : i32
      %c3072_i32 = arith.constant 3072 : i32
      %390 = arith.ori %387, %c3072_i32 : i32
      %391 = vector.broadcast %388 : i32 to vector<1x2x128xi32>
      %392 = arith.cmpi sge, %51, %391 : vector<1x2x128xi32>
      %cst_113 = arith.constant 1.000000e+00 : f32
      %cst_114 = arith.constant 0.000000e+00 : f32
      %393 = vector.broadcast %cst_113 : f32 to vector<1x2x128xf32>
      %394 = vector.broadcast %cst_114 : f32 to vector<1x2x128xf32>
      %395 = arith.select %392, %393, %394 : vector<1x2x128xi1>, vector<1x2x128xf32>
      %396 = vector.shape_cast %395 : vector<1x2x128xf32> to vector<1x1x2x128xf32>
      %cst_115 = arith.constant dense<0.000000e+00> : vector<1xf32>
      %397 = vector.multi_reduction <add>, %396, %cst_115 [1, 2, 3] : vector<1x1x2x128xf32> to vector<1xf32>
      %398 = vector.shape_cast %397 : vector<1xf32> to vector<1x1x1x1xf32>
      %399 = vector.extract %398[0, 0, 0, 0] : f32 from vector<1x1x1x1xf32>
      %400 = vector.broadcast %389 : i32 to vector<1x2x128xi32>
      %401 = arith.cmpi sge, %51, %400 : vector<1x2x128xi32>
      %cst_116 = arith.constant 1.000000e+00 : f32
      %cst_117 = arith.constant 0.000000e+00 : f32
      %402 = vector.broadcast %cst_116 : f32 to vector<1x2x128xf32>
      %403 = vector.broadcast %cst_117 : f32 to vector<1x2x128xf32>
      %404 = arith.select %401, %402, %403 : vector<1x2x128xi1>, vector<1x2x128xf32>
      %405 = vector.shape_cast %404 : vector<1x2x128xf32> to vector<1x1x2x128xf32>
      %cst_118 = arith.constant dense<0.000000e+00> : vector<1xf32>
      %406 = vector.multi_reduction <add>, %405, %cst_118 [1, 2, 3] : vector<1x1x2x128xf32> to vector<1xf32>
      %407 = vector.shape_cast %406 : vector<1xf32> to vector<1x1x1x1xf32>
      %408 = vector.extract %407[0, 0, 0, 0] : f32 from vector<1x1x1x1xf32>
      %409 = vector.broadcast %390 : i32 to vector<1x2x128xi32>
      %410 = arith.cmpi sge, %51, %409 : vector<1x2x128xi32>
      %cst_119 = arith.constant 1.000000e+00 : f32
      %cst_120 = arith.constant 0.000000e+00 : f32
      %411 = vector.broadcast %cst_119 : f32 to vector<1x2x128xf32>
      %412 = vector.broadcast %cst_120 : f32 to vector<1x2x128xf32>
      %413 = arith.select %410, %411, %412 : vector<1x2x128xi1>, vector<1x2x128xf32>
      %414 = vector.shape_cast %413 : vector<1x2x128xf32> to vector<1x1x2x128xf32>
      %cst_121 = arith.constant dense<0.000000e+00> : vector<1xf32>
      %415 = vector.multi_reduction <add>, %414, %cst_121 [1, 2, 3] : vector<1x1x2x128xf32> to vector<1xf32>
      %416 = vector.shape_cast %415 : vector<1xf32> to vector<1x1x1x1xf32>
      %417 = vector.extract %416[0, 0, 0, 0] : f32 from vector<1x1x1x1xf32>
      %418 = arith.cmpf oge, %417, %50 : f32
      %419 = arith.cmpf oge, %408, %50 : f32
      %420 = arith.cmpf oge, %399, %50 : f32
      %421 = arith.select %420, %388, %387 : i32
      %422 = arith.select %419, %389, %421 : i32
      %423 = arith.select %418, %390, %422 : i32
      %c256_i32 = arith.constant 256 : i32
      %424 = arith.ori %423, %c256_i32 : i32
      %c512_i32 = arith.constant 512 : i32
      %425 = arith.ori %423, %c512_i32 : i32
      %c768_i32 = arith.constant 768 : i32
      %426 = arith.ori %423, %c768_i32 : i32
      %427 = vector.broadcast %424 : i32 to vector<1x2x128xi32>
      %428 = arith.cmpi sge, %51, %427 : vector<1x2x128xi32>
      %cst_122 = arith.constant 1.000000e+00 : f32
      %cst_123 = arith.constant 0.000000e+00 : f32
      %429 = vector.broadcast %cst_122 : f32 to vector<1x2x128xf32>
      %430 = vector.broadcast %cst_123 : f32 to vector<1x2x128xf32>
      %431 = arith.select %428, %429, %430 : vector<1x2x128xi1>, vector<1x2x128xf32>
      %432 = vector.shape_cast %431 : vector<1x2x128xf32> to vector<1x1x2x128xf32>
      %cst_124 = arith.constant dense<0.000000e+00> : vector<1xf32>
      %433 = vector.multi_reduction <add>, %432, %cst_124 [1, 2, 3] : vector<1x1x2x128xf32> to vector<1xf32>
      %434 = vector.shape_cast %433 : vector<1xf32> to vector<1x1x1x1xf32>
      %435 = vector.extract %434[0, 0, 0, 0] : f32 from vector<1x1x1x1xf32>
      %436 = vector.broadcast %425 : i32 to vector<1x2x128xi32>
      %437 = arith.cmpi sge, %51, %436 : vector<1x2x128xi32>
      %cst_125 = arith.constant 1.000000e+00 : f32
      %cst_126 = arith.constant 0.000000e+00 : f32
      %438 = vector.broadcast %cst_125 : f32 to vector<1x2x128xf32>
      %439 = vector.broadcast %cst_126 : f32 to vector<1x2x128xf32>
      %440 = arith.select %437, %438, %439 : vector<1x2x128xi1>, vector<1x2x128xf32>
      %441 = vector.shape_cast %440 : vector<1x2x128xf32> to vector<1x1x2x128xf32>
      %cst_127 = arith.constant dense<0.000000e+00> : vector<1xf32>
      %442 = vector.multi_reduction <add>, %441, %cst_127 [1, 2, 3] : vector<1x1x2x128xf32> to vector<1xf32>
      %443 = vector.shape_cast %442 : vector<1xf32> to vector<1x1x1x1xf32>
      %444 = vector.extract %443[0, 0, 0, 0] : f32 from vector<1x1x1x1xf32>
      %445 = vector.broadcast %426 : i32 to vector<1x2x128xi32>
      %446 = arith.cmpi sge, %51, %445 : vector<1x2x128xi32>
      %cst_128 = arith.constant 1.000000e+00 : f32
      %cst_129 = arith.constant 0.000000e+00 : f32
      %447 = vector.broadcast %cst_128 : f32 to vector<1x2x128xf32>
      %448 = vector.broadcast %cst_129 : f32 to vector<1x2x128xf32>
      %449 = arith.select %446, %447, %448 : vector<1x2x128xi1>, vector<1x2x128xf32>
      %450 = vector.shape_cast %449 : vector<1x2x128xf32> to vector<1x1x2x128xf32>
      %cst_130 = arith.constant dense<0.000000e+00> : vector<1xf32>
      %451 = vector.multi_reduction <add>, %450, %cst_130 [1, 2, 3] : vector<1x1x2x128xf32> to vector<1xf32>
      %452 = vector.shape_cast %451 : vector<1xf32> to vector<1x1x1x1xf32>
      %453 = vector.extract %452[0, 0, 0, 0] : f32 from vector<1x1x1x1xf32>
      %454 = arith.cmpf oge, %453, %50 : f32
      %455 = arith.cmpf oge, %444, %50 : f32
      %456 = arith.cmpf oge, %435, %50 : f32
      %457 = arith.select %456, %424, %423 : i32
      %458 = arith.select %455, %425, %457 : i32
      %459 = arith.select %454, %426, %458 : i32
      %c64_i32 = arith.constant 64 : i32
      %460 = arith.ori %459, %c64_i32 : i32
      %c128_i32 = arith.constant 128 : i32
      %461 = arith.ori %459, %c128_i32 : i32
      %c192_i32 = arith.constant 192 : i32
      %462 = arith.ori %459, %c192_i32 : i32
      %463 = vector.broadcast %460 : i32 to vector<1x2x128xi32>
      %464 = arith.cmpi sge, %51, %463 : vector<1x2x128xi32>
      %cst_131 = arith.constant 1.000000e+00 : f32
      %cst_132 = arith.constant 0.000000e+00 : f32
      %465 = vector.broadcast %cst_131 : f32 to vector<1x2x128xf32>
      %466 = vector.broadcast %cst_132 : f32 to vector<1x2x128xf32>
      %467 = arith.select %464, %465, %466 : vector<1x2x128xi1>, vector<1x2x128xf32>
      %468 = vector.shape_cast %467 : vector<1x2x128xf32> to vector<1x1x2x128xf32>
      %cst_133 = arith.constant dense<0.000000e+00> : vector<1xf32>
      %469 = vector.multi_reduction <add>, %468, %cst_133 [1, 2, 3] : vector<1x1x2x128xf32> to vector<1xf32>
      %470 = vector.shape_cast %469 : vector<1xf32> to vector<1x1x1x1xf32>
      %471 = vector.extract %470[0, 0, 0, 0] : f32 from vector<1x1x1x1xf32>
      %472 = vector.broadcast %461 : i32 to vector<1x2x128xi32>
      %473 = arith.cmpi sge, %51, %472 : vector<1x2x128xi32>
      %cst_134 = arith.constant 1.000000e+00 : f32
      %cst_135 = arith.constant 0.000000e+00 : f32
      %474 = vector.broadcast %cst_134 : f32 to vector<1x2x128xf32>
      %475 = vector.broadcast %cst_135 : f32 to vector<1x2x128xf32>
      %476 = arith.select %473, %474, %475 : vector<1x2x128xi1>, vector<1x2x128xf32>
      %477 = vector.shape_cast %476 : vector<1x2x128xf32> to vector<1x1x2x128xf32>
      %cst_136 = arith.constant dense<0.000000e+00> : vector<1xf32>
      %478 = vector.multi_reduction <add>, %477, %cst_136 [1, 2, 3] : vector<1x1x2x128xf32> to vector<1xf32>
      %479 = vector.shape_cast %478 : vector<1xf32> to vector<1x1x1x1xf32>
      %480 = vector.extract %479[0, 0, 0, 0] : f32 from vector<1x1x1x1xf32>
      %481 = vector.broadcast %462 : i32 to vector<1x2x128xi32>
      %482 = arith.cmpi sge, %51, %481 : vector<1x2x128xi32>
      %cst_137 = arith.constant 1.000000e+00 : f32
      %cst_138 = arith.constant 0.000000e+00 : f32
      %483 = vector.broadcast %cst_137 : f32 to vector<1x2x128xf32>
      %484 = vector.broadcast %cst_138 : f32 to vector<1x2x128xf32>
      %485 = arith.select %482, %483, %484 : vector<1x2x128xi1>, vector<1x2x128xf32>
      %486 = vector.shape_cast %485 : vector<1x2x128xf32> to vector<1x1x2x128xf32>
      %cst_139 = arith.constant dense<0.000000e+00> : vector<1xf32>
      %487 = vector.multi_reduction <add>, %486, %cst_139 [1, 2, 3] : vector<1x1x2x128xf32> to vector<1xf32>
      %488 = vector.shape_cast %487 : vector<1xf32> to vector<1x1x1x1xf32>
      %489 = vector.extract %488[0, 0, 0, 0] : f32 from vector<1x1x1x1xf32>
      %490 = arith.cmpf oge, %489, %50 : f32
      %491 = arith.cmpf oge, %480, %50 : f32
      %492 = arith.cmpf oge, %471, %50 : f32
      %493 = arith.select %492, %460, %459 : i32
      %494 = arith.select %491, %461, %493 : i32
      %495 = arith.select %490, %462, %494 : i32
      %c16_i32 = arith.constant 16 : i32
      %496 = arith.ori %495, %c16_i32 : i32
      %c32_i32 = arith.constant 32 : i32
      %497 = arith.ori %495, %c32_i32 : i32
      %c48_i32 = arith.constant 48 : i32
      %498 = arith.ori %495, %c48_i32 : i32
      %499 = vector.broadcast %496 : i32 to vector<1x2x128xi32>
      %500 = arith.cmpi sge, %51, %499 : vector<1x2x128xi32>
      %cst_140 = arith.constant 1.000000e+00 : f32
      %cst_141 = arith.constant 0.000000e+00 : f32
      %501 = vector.broadcast %cst_140 : f32 to vector<1x2x128xf32>
      %502 = vector.broadcast %cst_141 : f32 to vector<1x2x128xf32>
      %503 = arith.select %500, %501, %502 : vector<1x2x128xi1>, vector<1x2x128xf32>
      %504 = vector.shape_cast %503 : vector<1x2x128xf32> to vector<1x1x2x128xf32>
      %cst_142 = arith.constant dense<0.000000e+00> : vector<1xf32>
      %505 = vector.multi_reduction <add>, %504, %cst_142 [1, 2, 3] : vector<1x1x2x128xf32> to vector<1xf32>
      %506 = vector.shape_cast %505 : vector<1xf32> to vector<1x1x1x1xf32>
      %507 = vector.extract %506[0, 0, 0, 0] : f32 from vector<1x1x1x1xf32>
      %508 = vector.broadcast %497 : i32 to vector<1x2x128xi32>
      %509 = arith.cmpi sge, %51, %508 : vector<1x2x128xi32>
      %cst_143 = arith.constant 1.000000e+00 : f32
      %cst_144 = arith.constant 0.000000e+00 : f32
      %510 = vector.broadcast %cst_143 : f32 to vector<1x2x128xf32>
      %511 = vector.broadcast %cst_144 : f32 to vector<1x2x128xf32>
      %512 = arith.select %509, %510, %511 : vector<1x2x128xi1>, vector<1x2x128xf32>
      %513 = vector.shape_cast %512 : vector<1x2x128xf32> to vector<1x1x2x128xf32>
      %cst_145 = arith.constant dense<0.000000e+00> : vector<1xf32>
      %514 = vector.multi_reduction <add>, %513, %cst_145 [1, 2, 3] : vector<1x1x2x128xf32> to vector<1xf32>
      %515 = vector.shape_cast %514 : vector<1xf32> to vector<1x1x1x1xf32>
      %516 = vector.extract %515[0, 0, 0, 0] : f32 from vector<1x1x1x1xf32>
      %517 = vector.broadcast %498 : i32 to vector<1x2x128xi32>
      %518 = arith.cmpi sge, %51, %517 : vector<1x2x128xi32>
      %cst_146 = arith.constant 1.000000e+00 : f32
      %cst_147 = arith.constant 0.000000e+00 : f32
      %519 = vector.broadcast %cst_146 : f32 to vector<1x2x128xf32>
      %520 = vector.broadcast %cst_147 : f32 to vector<1x2x128xf32>
      %521 = arith.select %518, %519, %520 : vector<1x2x128xi1>, vector<1x2x128xf32>
      %522 = vector.shape_cast %521 : vector<1x2x128xf32> to vector<1x1x2x128xf32>
      %cst_148 = arith.constant dense<0.000000e+00> : vector<1xf32>
      %523 = vector.multi_reduction <add>, %522, %cst_148 [1, 2, 3] : vector<1x1x2x128xf32> to vector<1xf32>
      %524 = vector.shape_cast %523 : vector<1xf32> to vector<1x1x1x1xf32>
      %525 = vector.extract %524[0, 0, 0, 0] : f32 from vector<1x1x1x1xf32>
      %526 = arith.cmpf oge, %525, %50 : f32
      %527 = arith.cmpf oge, %516, %50 : f32
      %528 = arith.cmpf oge, %507, %50 : f32
      %529 = arith.select %528, %496, %495 : i32
      %530 = arith.select %527, %497, %529 : i32
      %531 = arith.select %526, %498, %530 : i32
      %c4_i32 = arith.constant 4 : i32
      %532 = arith.ori %531, %c4_i32 : i32
      %c8_i32 = arith.constant 8 : i32
      %533 = arith.ori %531, %c8_i32 : i32
      %c12_i32 = arith.constant 12 : i32
      %534 = arith.ori %531, %c12_i32 : i32
      %535 = vector.broadcast %532 : i32 to vector<1x2x128xi32>
      %536 = arith.cmpi sge, %51, %535 : vector<1x2x128xi32>
      %cst_149 = arith.constant 1.000000e+00 : f32
      %cst_150 = arith.constant 0.000000e+00 : f32
      %537 = vector.broadcast %cst_149 : f32 to vector<1x2x128xf32>
      %538 = vector.broadcast %cst_150 : f32 to vector<1x2x128xf32>
      %539 = arith.select %536, %537, %538 : vector<1x2x128xi1>, vector<1x2x128xf32>
      %540 = vector.shape_cast %539 : vector<1x2x128xf32> to vector<1x1x2x128xf32>
      %cst_151 = arith.constant dense<0.000000e+00> : vector<1xf32>
      %541 = vector.multi_reduction <add>, %540, %cst_151 [1, 2, 3] : vector<1x1x2x128xf32> to vector<1xf32>
      %542 = vector.shape_cast %541 : vector<1xf32> to vector<1x1x1x1xf32>
      %543 = vector.extract %542[0, 0, 0, 0] : f32 from vector<1x1x1x1xf32>
      %544 = vector.broadcast %533 : i32 to vector<1x2x128xi32>
      %545 = arith.cmpi sge, %51, %544 : vector<1x2x128xi32>
      %cst_152 = arith.constant 1.000000e+00 : f32
      %cst_153 = arith.constant 0.000000e+00 : f32
      %546 = vector.broadcast %cst_152 : f32 to vector<1x2x128xf32>
      %547 = vector.broadcast %cst_153 : f32 to vector<1x2x128xf32>
      %548 = arith.select %545, %546, %547 : vector<1x2x128xi1>, vector<1x2x128xf32>
      %549 = vector.shape_cast %548 : vector<1x2x128xf32> to vector<1x1x2x128xf32>
      %cst_154 = arith.constant dense<0.000000e+00> : vector<1xf32>
      %550 = vector.multi_reduction <add>, %549, %cst_154 [1, 2, 3] : vector<1x1x2x128xf32> to vector<1xf32>
      %551 = vector.shape_cast %550 : vector<1xf32> to vector<1x1x1x1xf32>
      %552 = vector.extract %551[0, 0, 0, 0] : f32 from vector<1x1x1x1xf32>
      %553 = vector.broadcast %534 : i32 to vector<1x2x128xi32>
      %554 = arith.cmpi sge, %51, %553 : vector<1x2x128xi32>
      %cst_155 = arith.constant 1.000000e+00 : f32
      %cst_156 = arith.constant 0.000000e+00 : f32
      %555 = vector.broadcast %cst_155 : f32 to vector<1x2x128xf32>
      %556 = vector.broadcast %cst_156 : f32 to vector<1x2x128xf32>
      %557 = arith.select %554, %555, %556 : vector<1x2x128xi1>, vector<1x2x128xf32>
      %558 = vector.shape_cast %557 : vector<1x2x128xf32> to vector<1x1x2x128xf32>
      %cst_157 = arith.constant dense<0.000000e+00> : vector<1xf32>
      %559 = vector.multi_reduction <add>, %558, %cst_157 [1, 2, 3] : vector<1x1x2x128xf32> to vector<1xf32>
      %560 = vector.shape_cast %559 : vector<1xf32> to vector<1x1x1x1xf32>
      %561 = vector.extract %560[0, 0, 0, 0] : f32 from vector<1x1x1x1xf32>
      %562 = arith.cmpf oge, %561, %50 : f32
      %563 = arith.cmpf oge, %552, %50 : f32
      %564 = arith.cmpf oge, %543, %50 : f32
      %565 = arith.select %564, %532, %531 : i32
      %566 = arith.select %563, %533, %565 : i32
      %567 = arith.select %562, %534, %566 : i32
      %c1_i32 = arith.constant 1 : i32
      %568 = arith.ori %567, %c1_i32 : i32
      %c2_i32 = arith.constant 2 : i32
      %569 = arith.ori %567, %c2_i32 : i32
      %c3_i32 = arith.constant 3 : i32
      %570 = arith.ori %567, %c3_i32 : i32
      %571 = vector.broadcast %568 : i32 to vector<1x2x128xi32>
      %572 = arith.cmpi sge, %51, %571 : vector<1x2x128xi32>
      %cst_158 = arith.constant 1.000000e+00 : f32
      %cst_159 = arith.constant 0.000000e+00 : f32
      %573 = vector.broadcast %cst_158 : f32 to vector<1x2x128xf32>
      %574 = vector.broadcast %cst_159 : f32 to vector<1x2x128xf32>
      %575 = arith.select %572, %573, %574 : vector<1x2x128xi1>, vector<1x2x128xf32>
      %576 = vector.shape_cast %575 : vector<1x2x128xf32> to vector<1x1x2x128xf32>
      %cst_160 = arith.constant dense<0.000000e+00> : vector<1xf32>
      %577 = vector.multi_reduction <add>, %576, %cst_160 [1, 2, 3] : vector<1x1x2x128xf32> to vector<1xf32>
      %578 = vector.shape_cast %577 : vector<1xf32> to vector<1x1x1x1xf32>
      %579 = vector.extract %578[0, 0, 0, 0] : f32 from vector<1x1x1x1xf32>
      %580 = vector.broadcast %569 : i32 to vector<1x2x128xi32>
      %581 = arith.cmpi sge, %51, %580 : vector<1x2x128xi32>
      %cst_161 = arith.constant 1.000000e+00 : f32
      %cst_162 = arith.constant 0.000000e+00 : f32
      %582 = vector.broadcast %cst_161 : f32 to vector<1x2x128xf32>
      %583 = vector.broadcast %cst_162 : f32 to vector<1x2x128xf32>
      %584 = arith.select %581, %582, %583 : vector<1x2x128xi1>, vector<1x2x128xf32>
      %585 = vector.shape_cast %584 : vector<1x2x128xf32> to vector<1x1x2x128xf32>
      %cst_163 = arith.constant dense<0.000000e+00> : vector<1xf32>
      %586 = vector.multi_reduction <add>, %585, %cst_163 [1, 2, 3] : vector<1x1x2x128xf32> to vector<1xf32>
      %587 = vector.shape_cast %586 : vector<1xf32> to vector<1x1x1x1xf32>
      %588 = vector.extract %587[0, 0, 0, 0] : f32 from vector<1x1x1x1xf32>
      %589 = vector.broadcast %570 : i32 to vector<1x2x128xi32>
      %590 = arith.cmpi sge, %51, %589 : vector<1x2x128xi32>
      %cst_164 = arith.constant 1.000000e+00 : f32
      %cst_165 = arith.constant 0.000000e+00 : f32
      %591 = vector.broadcast %cst_164 : f32 to vector<1x2x128xf32>
      %592 = vector.broadcast %cst_165 : f32 to vector<1x2x128xf32>
      %593 = arith.select %590, %591, %592 : vector<1x2x128xi1>, vector<1x2x128xf32>
      %594 = vector.shape_cast %593 : vector<1x2x128xf32> to vector<1x1x2x128xf32>
      %cst_166 = arith.constant dense<0.000000e+00> : vector<1xf32>
      %595 = vector.multi_reduction <add>, %594, %cst_166 [1, 2, 3] : vector<1x1x2x128xf32> to vector<1xf32>
      %596 = vector.shape_cast %595 : vector<1xf32> to vector<1x1x1x1xf32>
      %597 = vector.extract %596[0, 0, 0, 0] : f32 from vector<1x1x1x1xf32>
      %598 = arith.cmpf oge, %597, %50 : f32
      %599 = arith.cmpf oge, %588, %50 : f32
      %600 = arith.cmpf oge, %579, %50 : f32
      %601 = arith.select %600, %568, %567 : i32
      %602 = arith.select %599, %569, %601 : i32
      %603 = arith.select %598, %570, %602 : i32
      %604 = vector.broadcast %603 : i32 to vector<1x2x128xi32>
      %605 = arith.cmpi eq, %51, %604 : vector<1x2x128xi32>
      %cst_167 = arith.constant 0.000000e+00 : f32
      %606 = vector.broadcast %cst_167 : f32 to vector<1x2x128xf32>
      %607 = arith.select %605, %49, %606 : vector<1x2x128xi1>, vector<1x2x128xf32>
      %608 = vector.shape_cast %607 : vector<1x2x128xf32> to vector<1x1x2x128xf32>
      %cst_168 = arith.constant dense<0xFF800000> : vector<1xf32>
      %609 = vector.multi_reduction <maximumf>, %608, %cst_168 [1, 2, 3] : vector<1x1x2x128xf32> to vector<1xf32>
      %610 = vector.shape_cast %609 : vector<1xf32> to vector<1x1x1x1xf32>
      %611 = vector.extract %610[0, 0, 0, 0] : f32 from vector<1x1x1x1xf32>
      %612 = vector.broadcast %603 : i32 to vector<1x2x128xi32>
      %613 = arith.cmpi sgt, %51, %612 : vector<1x2x128xi32>
      %cst_169 = arith.constant 1.000000e+00 : f32
      %cst_170 = arith.constant 0.000000e+00 : f32
      %614 = vector.broadcast %cst_169 : f32 to vector<1x2x128xf32>
      %615 = vector.broadcast %cst_170 : f32 to vector<1x2x128xf32>
      %616 = arith.select %613, %614, %615 : vector<1x2x128xi1>, vector<1x2x128xf32>
      %617 = vector.shape_cast %616 : vector<1x2x128xf32> to vector<1x1x2x128xf32>
      %cst_171 = arith.constant dense<0.000000e+00> : vector<1xf32>
      %618 = vector.multi_reduction <add>, %617, %cst_171 [1, 2, 3] : vector<1x1x2x128xf32> to vector<1xf32>
      %619 = vector.shape_cast %618 : vector<1xf32> to vector<1x1x1x1xf32>
      %620 = vector.extract %619[0, 0, 0, 0] : f32 from vector<1x1x1x1xf32>
      %cst_172 = arith.constant 0.000000e+00 : f32
      %621 = vector.broadcast %cst_172 : f32 to vector<1x2x128xf32>
      %622 = arith.select %613, %49, %621 : vector<1x2x128xi1>, vector<1x2x128xf32>
      %623 = vector.shape_cast %622 : vector<1x2x128xf32> to vector<1x1x2x128xf32>
      %cst_173 = arith.constant dense<0.000000e+00> : vector<1xf32>
      %624 = vector.multi_reduction <add>, %623, %cst_173 [1, 2, 3] : vector<1x1x2x128xf32> to vector<1xf32>
      %625 = vector.shape_cast %624 : vector<1xf32> to vector<1x1x1x1xf32>
      %626 = vector.extract %625[0, 0, 0, 0] : f32 from vector<1x1x1x1xf32>
      %627 = arith.subf %50, %620 : f32
      %628 = arith.mulf %627, %611 : f32
      %629 = arith.addf %626, %628 : f32
      %630 = arith.divf %629, %50 : f32
      %cst_174 = arith.constant 0.000000e+00 : f32
      %631 = arith.select %31, %630, %cst_174 : f32
      %632 = arith.addf %38, %631 : f32
      %633 = vector.broadcast %632 : f32 to vector<1x1x128xf32>
      %c0_175 = arith.constant 0 : index
      %c0_176 = arith.constant 0 : index
      %c0_177 = arith.constant 0 : index
      %634 = vector.load %arg4[%c0_175, %c0_176, %c0_177] : memref<1x1x128xf32, #tpu.memory_space<vmem>>, vector<1x1x128xf32>
      tpu.vector_store %arg4[%c0_175, %c0_176, %c0_177], %633 {strides = array<i32>} : memref<1x1x128xf32, #tpu.memory_space<vmem>>, vector<1x1x128xf32>,
    } else {
    }
    %true_21 = arith.constant true
    %41 = arith.xori %31, %true_21 : i1
    %42 = arith.extui %41 : i1 to i32
    %c0_i32_22 = arith.constant 0 : i32
    %43 = arith.cmpi ne, %42, %c0_i32_22 : i32
    scf.if %43 {
      %44 = vector.broadcast %38 : f32 to vector<1x1x128xf32>
      %c0_23 = arith.constant 0 : index
      %c0_24 = arith.constant 0 : index
      %c0_25 = arith.constant 0 : index
      %45 = vector.load %arg4[%c0_23, %c0_24, %c0_25] : memref<1x1x128xf32, #tpu.memory_space<vmem>>, vector<1x1x128xf32>
      tpu.vector_store %arg4[%c0_23, %c0_24, %c0_25], %44 {strides = array<i32>} : memref<1x1x128xf32, #tpu.memory_space<vmem>>, vector<1x1x128xf32>,
    } else {
    }
    return
  }
  func.func @transform_0(%arg0: i32) -> (i32, i32, i32) {
    %c0_i32 = arith.constant 0 : i32
    %c0_i32_0 = arith.constant 0 : i32
    %c0_i32_1 = arith.constant 0 : i32
    return %arg0, %c0_i32, %c0_i32_0 : i32, i32, i32
  }
  func.func @transform_1(%arg0: i32) -> (i32, i32, i32) {
    %c0_i32 = arith.constant 0 : i32
    %c0_i32_0 = arith.constant 0 : i32
    %c0_i32_1 = arith.constant 0 : i32
    return %arg0, %c0_i32, %c0_i32_0 : i32, i32, i32
  }
  func.func @transform_2(%arg0: i32) -> (i32, i32, i32) {
    %c0_i32 = arith.constant 0 : i32
    %c0_i32_0 = arith.constant 0 : i32
    %c0_i32_1 = arith.constant 0 : i32
    return %arg0, %c0_i32, %c0_i32_0 : i32, i32, i32
  }
  func.func @transform_3(%arg0: i32) -> (i32, i32, i32) {
    %c0_i32 = arith.constant 0 : i32
    %c0_i32_0 = arith.constant 0 : i32
    %c0_i32_1 = arith.constant 0 : i32
    return %arg0, %c0_i32, %c0_i32_0 : i32, i32, i32
  }
}

</mosaic_0001>

<bundles_post_ra>
// kernel: tpu_custom_call.1
= control target key start
LH: loop header
LB: loop body
LE: loop exit
PB: predicated region body
PF: predicated region fallthrough
CT: control target
= control target key end

     0   :  { %s2334_s0 = inlined_call_operand.hbm [shape: f32[2,2,128], index: 0, kind: input, shape index: {}]   ;;  %s2335_s1 = inlined_call_operand.hbm [shape: f32[2,2,128], index: 1, kind: input, shape index: {}]   ;;  %s2336_s2 = inlined_call_operand.hbm [shape: f32[2,2,128], index: 2, kind: input, shape index: {}]   ;;  %s2337_s3 = inlined_call_operand.hbm [shape: f32[2,1,128], index: 3, kind: output, shape index: {}]  }
   0x1   :  { %2341 = sst [smem:[#allocation13_spill]] %s2334_s0 }
   0x2   :  { %2342 = sst [smem:[#allocation14_spill]] %s2335_s1 }
   0x3   :  { %8 = vsyncpa [#allocation3], 0 }
   0x4   :  { %10 = vsyncpa [#allocation3 + $0x1], 0 }
   0x5   :  { %11 = vsyncpa [#allocation6], 0 }
   0x6   :  { %13 = vsyncpa [#allocation6 + $0x1], 0 }
   0x7   :  { %14 = vsyncpa [#allocation4], 0 }
   0x8   :  { %16 = vsyncpa [#allocation4 + $0x1], 0  ;;  %s1609_s12 = smov 0   ;;  %s1611_s13 = smov 0  }
   0x9   :  { %s1613_s14 = smov 0   ;;  %s1615_s15 = smov 0  }
   0xa LB: > { %s1630_s16 = sadd.s32 4294967295, %s1579_s15   ;;  %s1234_s17 = sadd.s32 4294967294, %s1579_s15   ;;  %s1579_s15 = sphi %s1615_s15, %s2364_s15   ;;  %s1575_s14 = sphi %s1613_s14, %s2363_s14   ;;  %s1571_s13 = sphi %s1611_s13, %s2362_s13   ;;  %s1567_s12 = sphi %s1609_s12, %s2361_s12  }
   0xb   : > { %s1634_s18 = sadd.s32 1, %s1579_s15   ;;  %s29_s19 = sadd.s32 1, %s1575_s14 }
   0xc   : > { %s26_s20 = ssub.s32 %s1579_s15, %s1634_s18  ;;  %p36_p0 = scmp.ne.s32.totalorder %s1575_s14, %s1571_s13 }
   0xd   : > { %p27_p1 = scmp.eq.s32.totalorder %s26_s20, 0  ;;  %p37_p2 = scmp.eq.s32.totalorder %s1579_s15, 0 }
   0xe   : > { %p42_p3 = scmp.ne.s32.totalorder %s1571_s13, %s1567_s12  ;;  %p43_p4 = scmp.eq.s32.totalorder %s1630_s16, 0 }
   0xf   : > { %s1646_s21 = scalar_select %p27_p1, %s1575_s14, %s29_s19  }
  0x10   : > { %p38_p5 = por %p37_p2, %p36_p0  ;;  %p1648_p6 = por %p43_p4, %p42_p3 }
  0x11   : > { %2343 = sst [smem:[#allocation12_spill]] %s1646_s21  ;;  %p118_p7 = scmp.eq.s32.totalorder %s1630_s16, 1 }
  0x12   : > { %s2344_s22 = scalar_select %p1648_p6, 1, 0 }
  0x13   : > { %p124_p8 = scmp.eq.s32.totalorder %s1234_s17, 1  ;;  %p1383_p10 = scmp.lt.s32.totalorder %s1579_s15, 2 }
  0x14   : > { %p1655_p11 = por %p118_p7, %p36_p0  ;;  %s2338_s25 = sand.u32 1, %s1575_s14  }
  0x15   : > { %p1659_p12 = por %p124_p8, %p42_p3  ;;  %s1665_s26 = sshll.u32 %s1579_s15, 5 }
  0x16   : > { %s2345_s23 = scalar_select %p1655_p11, 1, 0 }
  0x17   : > { %s2346_s24 = scalar_select %p1659_p12, 1, 0 }
  0x18   : > { %s1669_s27 = sshll.u32 %s2338_s25, 1  ;;  %p1671_p13 = pnand %p1383_p10, %p38_p5 }
  0x19   : > { %s162_s29 = sand.u32 1, %s1579_s15   ;;  %s2348_s1 = sld [smem:[#allocation14_spill]] }
  0x1a   : > { %s166_s6 = scalar_lea.vmem [#allocation5], %s1669_s27  ;;  %s1684_s8 = scalar_lea.sflag [#allocation6], %s162_s29 }
  0x1b   : > { %s173_s7 = sshll.u32 %s166_s6, 4  ;;  %p1690_p2 = pneg %p1671_p13  ;;  %s174_s7 = int_to_ptr.vmem [resolvable:$true] %s173_s7 }
  0x1f   : > { %s1680_s5 = scalar_lea.hbm %s2348_s1, %s1665_s26  ;;  %s1432_s19 = scalar_lea.hbm %s2348_s1, 64 }
  0x20   : > { %s1427_s9 = scalar_lea.hbm %s1680_s5, 32  ;;  %p1433_p5 = scmp.lt.s32.totalorder %s1680_s5, %s2348_s1 }
  0x21   : > { %p1428_p1 = scmp.ne.s32.totalorder %s1680_s5, %s1427_s9  ;;  %p1434_p7 = scmp.lt.s32.totalorder %s1432_s19, %s1427_s9 }
  0x23   : > { %p1430_p3 = pnand %p1690_p2, %p1428_p1  ;;  %p1435_p8 = por %p1434_p7, %p1433_p5 }
  0x25   : > { %p1431_p4 = pneg %p1430_p3 }
  0x27   : > { %p1436_p10 = pnand %p1435_p8, %p1431_p4 }
  0x29   : > { %1439 = shalt.err (!%p1436_p10)
}
  0x2a   : > { %s1440_s29 = scalar_lea.vmem %s174_s7, 32  ;;  %s1581_s4 = smov [#allocation5]  }
  0x2b   : > { %p1441_p9 = scmp.ne.s32.totalorder %s174_s7, %s1440_s29  ;;  %s1445_s6 = sshll.u32 %s1581_s4, 4  ;;  %s1446_s6 = int_to_ptr.vmem [resolvable:$false] %s1445_s6 }
  0x2c   : > { %s1447_s25 = scalar_lea.vmem %s1446_s6, 64  ;;  %p1448_p1 = scmp.lt.s32.totalorder %s174_s7, %s1446_s6 }
  0x2d   : > { %p1443_p0 = pnand %p1441_p9, %p1690_p2  ;;  %p1449_p3 = scmp.lt.s32.totalorder %s1447_s25, %s1440_s29 }
  0x2f   : > { %p1444_p12 = pneg %p1443_p0  ;;  %p1450_p11 = por %p1449_p3, %p1448_p1 }
  0x31   : > { %p1451_p6 = pnand %p1450_p11, %p1444_p12 }
  0x33   : > { %1454 = shalt.err (!%p1451_p6)
}
  0x34   : > { %1375 = dma.hbm_to_vmem [thread:$0]  (!%p1671_p13), %s1680_s5, 32, %s174_s7, %s1684_s8  }
  0x35   : > { %p196_p9 = scmp.lt.s32.totalorder %s1579_s15, 3  ;;  %s2350_s0 = sld [smem:[#allocation13_spill]] }
  0x36   : > { %p2351_p0 = scmp.ge.s32.totalorder %s1579_s15, 1  ;;  %s148_s19 = scalar_lea.vmem [#allocation2], %s1669_s27 }
  0x37   : > { %s155_s20 = sshll.u32 %s148_s19, 4  ;;  %s2353_s30 = sand.u32 1, %s1575_s14   ;;  %s156_s20 = int_to_ptr.vmem [resolvable:$true] %s155_s20 }
  0x38   : > { %p1718_p6 = pnand %p2351_p0, %p196_p9  ;;  %s145_s29 = scalar_lea.sflag [#allocation3], %s2353_s30 }
  0x3a   : > { %s2352_s25 = scalar_select %p1718_p6, 1, 0 }
  0x3b   : > { %s1714_s17 = scalar_lea.hbm %s2350_s0, %s1665_s26  ;;  %s1460_s6 = scalar_lea.hbm %s2350_s0, 64 }
  0x3c   : > { %s1455_s5 = scalar_lea.hbm %s1714_s17, 32  ;;  %p1461_p5 = scmp.lt.s32.totalorder %s1714_s17, %s2350_s0 }
  0x3d   : > { %p1456_p11 = scmp.ne.s32.totalorder %s1714_s17, %s1455_s5  ;;  %p1462_p7 = scmp.lt.s32.totalorder %s1460_s6, %s1455_s5 }
  0x3f   : > { %p1458_p12 = pnand %p1456_p11, %p1690_p2  ;;  %p1463_p8 = por %p1462_p7, %p1461_p5 }
  0x41   : > { %p1459_p4 = pneg %p1458_p12 }
  0x43   : > { %p1464_p10 = pnand %p1463_p8, %p1459_p4 }
  0x45   : > { %1467 = shalt.err (!%p1464_p10)
}
  0x46   : > { %s1468_s19 = scalar_lea.vmem %s156_s20, 32  ;;  %s1582_s30 = smov [#allocation2]  }
  0x47   : > { %p1469_p1 = scmp.ne.s32.totalorder %s156_s20, %s1468_s19  ;;  %s1473_s1 = sshll.u32 %s1582_s30, 4  ;;  %s1474_s1 = int_to_ptr.vmem [resolvable:$false] %s1473_s1 }
  0x48   : > { %s1475_s21 = scalar_lea.vmem %s1474_s1, 64  ;;  %p1476_p0 = scmp.lt.s32.totalorder %s156_s20, %s1474_s1 }
  0x49   : > { %p1471_p3 = pnand %p1469_p1, %p1690_p2  ;;  %p1477_p11 = scmp.lt.s32.totalorder %s1475_s21, %s1468_s19 }
  0x4b   : > { %p1472_p9 = pneg %p1471_p3  ;;  %p1478_p12 = por %p1477_p11, %p1476_p0 }
  0x4d   : > { %p1479_p6 = pnand %p1478_p12, %p1472_p9 }
  0x4f   : > { %1482 = shalt.err (!%p1479_p6)
}
  0x50   : > { %1372 = dma.hbm_to_vmem [thread:$0]  (!%p1671_p13), %s1714_s17, 32, %s156_s20, %s145_s29  }
  0x51   : > { %s189_s4 = scalar_lea.hbm %s2336_s2, %s1665_s26  ;;  %s184_s6 = scalar_lea.vmem [#allocation7], %s1669_s27 }
  0x52   : > { %s191_s9 = sshll.u32 %s184_s6, 4  ;;  %s1483_s11 = scalar_lea.hbm %s189_s4, 32  ;;  %s192_s9 = int_to_ptr.vmem [resolvable:$true] %s191_s9 }
  0x53   : > { %p1484_p4 = scmp.ne.s32.totalorder %s189_s4, %s1483_s11  ;;  %s1488_s19 = scalar_lea.hbm %s2336_s2, 64 }
  0x54   : > { %p1489_p6 = scmp.lt.s32.totalorder %s189_s4, %s2336_s2  ;;  %p1490_p8 = scmp.lt.s32.totalorder %s1488_s19, %s1483_s11 }
  0x55   : > { %p1486_p5 = pnand %p1484_p4, %p1690_p2 }
  0x56   : > { %p1491_p10 = por %p1490_p8, %p1489_p6 }
  0x57   : > { %p1487_p7 = pneg %p1486_p5 }
  0x59   : > { %p1492_p1 = pnand %p1491_p10, %p1487_p7 }
  0x5b   : > { %1495 = shalt.err (!%p1492_p1)
}
  0x5c   : > { %s1496_s26 = scalar_lea.vmem %s192_s9, 32  ;;  %s1583_s27 = smov [#allocation7]  }
  0x5d   : > { %p1497_p3 = scmp.ne.s32.totalorder %s192_s9, %s1496_s26  ;;  %s1501_s17 = sshll.u32 %s1583_s27, 4  ;;  %s1502_s17 = int_to_ptr.vmem [resolvable:$false] %s1501_s17 }
  0x5e   : > { %s1503_s20 = scalar_lea.vmem %s1502_s17, 64  ;;  %p1504_p11 = scmp.lt.s32.totalorder %s192_s9, %s1502_s17 }
  0x5f   : > { %p1499_p9 = pnand %p1497_p3, %p1690_p2  ;;  %p1505_p12 = scmp.lt.s32.totalorder %s1503_s20, %s1496_s26 }
  0x61   : > { %p1500_p0 = pneg %p1499_p9  ;;  %p1506_p4 = por %p1505_p12, %p1504_p11 }
  0x63   : > { %p1507_p5 = pnand %p1506_p4, %p1500_p0 }
  0x65   : > { %1510 = shalt.err (!%p1507_p5)
}
  0x66   : > { %1378 = dma.hbm_to_vmem [thread:$0]  (!%p1671_p13), %s189_s4, 32, %s192_s9, %s1684_s8  }
  0x67   : > { %p2354_p7 = scmp.ne.s32.totalorder %s2352_s25, 0 }
  0x68   : > { %s1762_s0 = sand.u32 (!%p2354_p7), 1, %s1571_s13   ;;  %p2355_p2 = scmp.ne.s32.totalorder (!%p2354_p7), %s2344_s22, 0 }
  0x69   : > { %200 = sbr.rel (%p2354_p7) target bundleno = 4033 (0xfc1), region = 32  ;;  %s1244_s10 = sshll.u32 (!%p2354_p7), %s1762_s0, 1 }
  0x6a   : > { %s203_s29 = scalar_lea.sflag (!%p2354_p7), [#allocation3], %s1762_s0  ;;  %s206_s5 = scalar_lea.vmem (!%p2354_p7), [#allocation2], %s1244_s10 }
  0x6e   : > { %1554 = dma.done.wait (%p2355_p2), %s203_s29, 32  }
  0x6f   : > { %1556 = vsyncadd (%p2355_p2), %s203_s29, 4294967264  ;;  %s211_s28 = sand.u32 1, %s1630_s16   ;;  %s215_s25 = scalar_lea.vmem [#allocation5], %s1244_s10 }
  0x70   : > { %s212_s8 = scalar_lea.sflag [#allocation6], %s211_s28 }
  0x71   : > { %1558 = dma.done.wait (%p2355_p2), %s212_s8, 64  }
  0x72   : > { %1560 = vsyncadd (%p2355_p2), %s212_s8, 4294967232  ;;  %v1775_v0 = vld [vmem:[%s206_s5] sm:$0x3]  ;;  %v257_v1 = vld [vmem:[%s215_s25] sm:$0x3]  ;;  %vm264_vm0 = vcmask 1041408  }
  0x73   : > { %vm262_vm1 = vcmp.ge.f32.partialorder %v1775_v0, 0.1  ;;  %v258_v2 = vsub.f32 %v257_v1, %v1775_v0  ;;  %v1584_v3 = vmov 0.0   ;;  %s224_s7 = scalar_lea.vmem [#allocation7], %s1244_s10  ;;  %s1585_s9 = smov 1.0  }
  0x74   : > { %v263_v4 = vsel %vm262_vm1, 1.0, %v1584_v3  ;;  %v260_v5 = vld [vmem:[%s224_s7] sm:$0x3]  ;;  %s1811_s5 = scalar_lea.vmem [#allocation8], %s1762_s0 }
  0x75   : > { %v265_v6 = vsel %vm264_vm0, %v263_v4, 0.0  ;;  %v259_v7 = vmul.f32 %v258_v2, %v258_v2 }
  0x76   : > { %266 = vadd.xlane.f32.xlu0 %v265_v6 }
  0x77   : > { %v1782_v8 = vmul.f32 %v260_v5, %v259_v7 }
  0x79   : > { %v286_v9 = vsel %vm264_vm0, %v1782_v8, 0.0  ;;  %v275_v10 = vsel %vm262_vm1, %v1782_v8, 0.0 }
  0x7a   : > { %287 = vadd.xlane.f32.xlu1 %v286_v9  ;;  %v276_v11 = vsel %vm264_vm0, %v275_v10, 0.0 }
  0x7b   : > { %277 = vadd.xlane.f32.xlu0 %v276_v11 }
  0xff   : > { %v267_v12 = vpop.xlane.xlu0 %266 }
 0x100   : > { %v268_v13 = vrot.slane %v267_v12, 4 }
 0x102   : > { %v269_v14 = vadd.f32 %v268_v13, %v267_v12 }
 0x103   : > { %v288_v15 = vpop.xlane.xlu1 %287 }
 0x104   : > { %v270_v16 = vrot.slane %v269_v14, 2  ;;  %v289_v17 = vrot.slane %v288_v15, 4  ;;  %v278_v18 = vpop.xlane.xlu0 %277 }
 0x105   : > { %v279_v19 = vrot.slane %v278_v18, 4 }
 0x106   : > { %v271_v20 = vadd.f32 %v270_v16, %v269_v14  ;;  %v290_v21 = vadd.f32 %v289_v17, %v288_v15 }
 0x107   : > { %v280_v22 = vadd.f32 %v279_v19, %v278_v18 }
 0x108   : > { %v272_v23 = vrot.slane %v271_v20, 1  ;;  %v291_v24 = vrot.slane %v290_v21, 2 }
 0x109   : > { %v281_v25 = vrot.slane %v280_v22, 2 }
 0x10a   : > { %v273_v26 = vadd.f32 %v272_v23, %v271_v20  ;;  %v292_v27 = vadd.f32 %v291_v24, %v290_v21 }
 0x10b   : > { %v282_v28 = vadd.f32 %v281_v25, %v280_v22 }
 0x10c   : > { %1251 = vpush %v273_v26  ;;  %v293_v29 = vrot.slane %v292_v27, 1 }
 0x10d   : > { %v283_v30 = vrot.slane %v282_v28, 1 }
 0x10e   : > { %v294_v31 = vadd.f32 %v293_v29, %v292_v27 }
 0x10f   : > { %v284_v32 = vadd.f32 %v283_v30, %v282_v28 }
 0x111   : > { %1253 = vpush %v284_v32 }
 0x112   : > { %1255 = vpush %v294_v31 }
 0x13d   : > { %s1790_s22 = spop %1251 }
 0x13e   : > { %s297_s4 = ssub.f32 256.0, %s1790_s22  ;;  %s299_s6 = smul.f32 3.0, %s1790_s22 }
 0x13f   : > { %s303_s11 = smax.f32 %s1585_s9, %s1790_s22  ;;  %p298_p13 = scmp.gt.f32.partialorder %s1790_s22, 0.0 }
 0x140   : > { %v304_v33 = vstv %s303_s11  ;;  %s308_s1 = smax.f32 %s1585_s9, %s297_s4  ;;  %p301_p6 = scmp.ge.f32.partialorder %s297_s4, %s299_s6 }
 0x141   : > { %1421 = vrcp.f32 %v304_v33  ;;  %v309_v34 = vstv %s308_s1  ;;  %p300_p8 = pneg %p298_p13 }
 0x142   : > { %1423 = vrcp.f32 %v309_v34  ;;  %s1254_s19 = spop %1253 }
 0x143   : > { %p1800_p10 = por %p301_p6, %p300_p8  ;;  %s1256_s30 = spop %1255 }
 0x144   : > { %s296_s26 = ssub.f32 %s1256_s30, %s1254_s19  ;;  %vm1586_vm2 = vmmov (%p1800_p10), 1   ;;  %v1587_v39 = vmov (%p1800_p10), 0.0  }
 0x145   : > { %vm319_vm3 = vmxor (%p1800_p10), %vm262_vm1, %vm1586_vm2 }
 0x14e   : > { %v1422_v35 = vpop.eup %1421 }
 0x14f   : > { %v1424_v36 = vpop.eup %1423  ;;  %1257 = vpush %v1422_v35 }
 0x150   : > { %1259 = vpush %v1424_v36 }
 0x180   : > { %s1258_s27 = spop %1257 }
 0x181   : > { %s307_s17 = smul.f32 %s1258_s27, %s1254_s19  ;;  %s1260_s20 = spop %1259 }
 0x182   : > { %s312_s10 = smul.f32 %s1260_s20, %s296_s26 }
 0x183   : > { %s2366_s17 = smov (!%p298_p13, %s307_s17), 0.0  ;;  %318 = sbr.rel (!%p1800_p10) target bundleno = 4002 (0xfa2), region = 48 }
 0x184   : > { %s2368_s10 = smov (%p1800_p10, %s312_s10), 0.0 }
 0x185   : > { %s1808_s29 = sadd.f32 %s2368_s10, %s2366_s17 }
 0x188   : > { %s1247_s28 = scalar_select %p298_p13, 0, 1 }
 0x189   : > { %s2370_s6 = smov (!%p298_p13, %s299_s6), 256.0 }
 0x18a   : > { %v321_v37 = vstv %s1247_s28 }
 0x18b   : > { %vm322_vm4 = vcmp.eq.s32.totalorder %v321_v37, 1 }
 0x18c   : > { %vm323_vm5 = vmor %vm319_vm3, %vm322_vm4 }
 0x18d   : > { %v1820_v38 = vsel %vm323_vm5, %v1782_v8, -1.0 }
 0x18e   : > { %vm327_vm6 = vcmp.ge.s32.totalorder %v1820_v38, 1073741824 }
 0x18f   : > { %v328_v40 = vsel %vm327_vm6, 1.0, %v1587_v39 }
 0x190   : > { %v329_v41 = vsel %vm264_vm0, %v328_v40, 0.0 }
 0x191   : > { %330 = vadd.xlane.f32.xlu0 %v329_v41 }
 0x21a   : > { %v331_v42 = vpop.xlane.xlu0 %330 }
 0x21b   : > { %v332_v43 = vrot.slane %v331_v42, 4 }
 0x21d   : > { %v333_v44 = vadd.f32 %v332_v43, %v331_v42 }
 0x21f   : > { %v334_v45 = vrot.slane %v333_v44, 2 }
 0x221   : > { %v335_v46 = vadd.f32 %v334_v45, %v333_v44 }
 0x223   : > { %v336_v47 = vrot.slane %v335_v46, 1 }
 0x225   : > { %v337_v48 = vadd.f32 %v336_v47, %v335_v46 }
 0x227   : > { %1261 = vpush %v337_v48 }
 0x258   : > { %s1262_s8 = spop %1261 }
 0x259   : > { %p339_p1 = scmp.ge.f32.partialorder %s1262_s8, %s2370_s6 }
 0x25b   : > { %s1832_s25 = scalar_select %p339_p1, 1073741824, 0 }
 0x25d   : > { %s342_s7 = sor.u32 536870912, %s1832_s25  ;;  %s341_s4 = sor.u32 268435456, %s1832_s25 }
 0x25e   : > { %v357_v49 = vstv %s342_s7  ;;  %v344_v50 = vstv %s341_s4  ;;  %s343_s22 = sor.u32 805306368, %s1832_s25 }
 0x25f   : > { %vm358_vm7 = vcmp.ge.s32.totalorder %v1820_v38, %v357_v49  ;;  %vm345_vm8 = vcmp.ge.s32.totalorder %v1820_v38, %v344_v50  ;;  %v370_v51 = vstv %s343_s22 }
 0x260   : > { %v359_v52 = vsel %vm358_vm7, 1.0, %v1587_v39  ;;  %v346_v53 = vsel %vm345_vm8, 1.0, %v1587_v39  ;;  %vm371_vm9 = vcmp.ge.s32.totalorder %v1820_v38, %v370_v51 }
 0x261   : > { %v360_v54 = vsel %vm264_vm0, %v359_v52, 0.0  ;;  %v347_v55 = vsel %vm264_vm0, %v346_v53, 0.0  ;;  %v372_v56 = vsel %vm371_vm9, 1.0, %v1587_v39 }
 0x262   : > { %361 = vadd.xlane.f32.xlu1 %v360_v54  ;;  %348 = vadd.xlane.f32.xlu0 %v347_v55  ;;  %v373_v57 = vsel %vm264_vm0, %v372_v56, 0.0 }
 0x266   : > { %374 = vadd.xlane.f32.xlu1 %v373_v57 }
 0x2eb   : > { %v362_v58 = vpop.xlane.xlu1 %361  ;;  %v349_v59 = vpop.xlane.xlu0 %348 }
 0x2ec   : > { %v363_v60 = vrot.slane %v362_v58, 4  ;;  %v350_v61 = vrot.slane %v349_v59, 4 }
 0x2ee   : > { %v364_v62 = vadd.f32 %v363_v60, %v362_v58  ;;  %v351_v63 = vadd.f32 %v350_v61, %v349_v59 }
 0x2ef   : > { %v375_v0 = vpop.xlane.xlu1 %374 }
 0x2f0   : > { %v365_v1 = vrot.slane %v364_v62, 2  ;;  %v352_v2 = vrot.slane %v351_v63, 2  ;;  %v376_v3 = vrot.slane %v375_v0, 4 }
 0x2f2   : > { %v377_v4 = vadd.f32 %v376_v3, %v375_v0  ;;  %v353_v5 = vadd.f32 %v352_v2, %v351_v63  ;;  %v366_v6 = vadd.f32 %v365_v1, %v364_v62 }
 0x2f4   : > { %v378_v7 = vrot.slane %v377_v4, 2  ;;  %v354_v8 = vrot.slane %v353_v5, 1  ;;  %v367_v9 = vrot.slane %v366_v6, 1 }
 0x2f6   : > { %v355_v10 = vadd.f32 %v354_v8, %v353_v5  ;;  %v368_v11 = vadd.f32 %v367_v9, %v366_v6  ;;  %v379_v12 = vadd.f32 %v378_v7, %v377_v4 }
 0x2f8   : > { %1263 = vpush %v355_v10  ;;  %v380_v13 = vrot.slane %v379_v12, 1 }
 0x2f9   : > { %1265 = vpush %v368_v11 }
 0x2fa   : > { %v381_v14 = vadd.f32 %v380_v13, %v379_v12 }
 0x2fc   : > { %1267 = vpush %v381_v14 }
 0x329   : > { %s1264_s9 = spop %1263 }
 0x32a   : > { %p385_p3 = scmp.ge.f32.partialorder %s1264_s9, %s2370_s6  ;;  %s1266_s11 = spop %1265 }
 0x32b   : > { %p384_p9 = scmp.ge.f32.partialorder %s1266_s11, %s2370_s6 }
 0x32c   : > { %s2372_s4 = smov (!%p385_p3, %s341_s4), %s1832_s25 }
 0x32d   : > { %s1268_s1 = spop %1267  ;;  %s2374_s7 = smov (!%p384_p9, %s342_s7), %s2372_s4 }
 0x32e   : > { %p383_p0 = scmp.ge.f32.partialorder %s1268_s1, %s2370_s6 }
 0x330   : > { %s2376_s22 = smov (!%p383_p0, %s343_s22), %s2374_s7 }
 0x331   : > { %s390_s19 = sor.u32 134217728, %s2376_s22  ;;  %s389_s30 = sor.u32 67108864, %s2376_s22 }
 0x332   : > { %v405_v15 = vstv %s390_s19  ;;  %v392_v16 = vstv %s389_s30  ;;  %s391_s26 = sor.u32 201326592, %s2376_s22 }
 0x333   : > { %vm406_vm10 = vcmp.ge.s32.totalorder %v1820_v38, %v405_v15  ;;  %vm393_vm11 = vcmp.ge.s32.totalorder %v1820_v38, %v392_v16  ;;  %v418_v17 = vstv %s391_s26 }
 0x334   : > { %v407_v18 = vsel %vm406_vm10, 1.0, %v1587_v39  ;;  %v394_v19 = vsel %vm393_vm11, 1.0, %v1587_v39  ;;  %vm419_vm12 = vcmp.ge.s32.totalorder %v1820_v38, %v418_v17 }
 0x335   : > { %v408_v20 = vsel %vm264_vm0, %v407_v18, 0.0  ;;  %v395_v21 = vsel %vm264_vm0, %v394_v19, 0.0  ;;  %v420_v22 = vsel %vm419_vm12, 1.0, %v1587_v39 }
 0x336   : > { %409 = vadd.xlane.f32.xlu1 %v408_v20  ;;  %396 = vadd.xlane.f32.xlu0 %v395_v21  ;;  %v421_v23 = vsel %vm264_vm0, %v420_v22, 0.0 }
 0x33a   : > { %422 = vadd.xlane.f32.xlu0 %v421_v23 }
 0x3bf   : > { %v410_v24 = vpop.xlane.xlu1 %409  ;;  %v397_v25 = vpop.xlane.xlu0 %396 }
 0x3c0   : > { %v411_v26 = vrot.slane %v410_v24, 4  ;;  %v398_v27 = vrot.slane %v397_v25, 4 }
 0x3c2   : > { %v412_v28 = vadd.f32 %v411_v26, %v410_v24  ;;  %v399_v29 = vadd.f32 %v398_v27, %v397_v25 }
 0x3c3   : > { %v423_v30 = vpop.xlane.xlu0 %422 }
 0x3c4   : > { %v413_v31 = vrot.slane %v412_v28, 2  ;;  %v400_v32 = vrot.slane %v399_v29, 2  ;;  %v424_v33 = vrot.slane %v423_v30, 4 }
 0x3c6   : > { %v425_v34 = vadd.f32 %v424_v33, %v423_v30  ;;  %v401_v35 = vadd.f32 %v400_v32, %v399_v29  ;;  %v414_v36 = vadd.f32 %v413_v31, %v412_v28 }
 0x3c8   : > { %v426_v37 = vrot.slane %v425_v34, 2  ;;  %v402_v40 = vrot.slane %v401_v35, 1  ;;  %v415_v41 = vrot.slane %v414_v36, 1 }
 0x3ca   : > { %v403_v42 = vadd.f32 %v402_v40, %v401_v35  ;;  %v416_v43 = vadd.f32 %v415_v41, %v414_v36  ;;  %v427_v44 = vadd.f32 %v426_v37, %v425_v34 }
 0x3cc   : > { %1269 = vpush %v403_v42  ;;  %v428_v45 = vrot.slane %v427_v44, 1 }
 0x3cd   : > { %1271 = vpush %v416_v43 }
 0x3ce   : > { %v429_v46 = vadd.f32 %v428_v45, %v427_v44 }
 0x3d0   : > { %1273 = vpush %v429_v46 }
 0x3fd   : > { %s1270_s27 = spop %1269 }
 0x3fe   : > { %p433_p11 = scmp.ge.f32.partialorder %s1270_s27, %s2370_s6  ;;  %s1272_s17 = spop %1271 }
 0x3ff   : > { %p432_p12 = scmp.ge.f32.partialorder %s1272_s17, %s2370_s6 }
 0x400   : > { %s2378_s30 = smov (!%p433_p11, %s389_s30), %s2376_s22 }
 0x401   : > { %s1274_s20 = spop %1273  ;;  %s2380_s19 = smov (!%p432_p12, %s390_s19), %s2378_s30 }
 0x402   : > { %p431_p4 = scmp.ge.f32.partialorder %s1274_s20, %s2370_s6 }
 0x404   : > { %s2382_s26 = smov (!%p431_p4, %s391_s26), %s2380_s19 }
 0x405   : > { %s438_s10 = sor.u32 33554432, %s2382_s26  ;;  %s437_s28 = sor.u32 16777216, %s2382_s26 }
 0x406   : > { %v453_v47 = vstv %s438_s10  ;;  %v440_v48 = vstv %s437_s28  ;;  %s439_s8 = sor.u32 50331648, %s2382_s26 }
 0x407   : > { %vm454_vm13 = vcmp.ge.s32.totalorder %v1820_v38, %v453_v47  ;;  %vm441_vm14 = vcmp.ge.s32.totalorder %v1820_v38, %v440_v48  ;;  %v466_v49 = vstv %s439_s8 }
 0x408   : > { %v455_v50 = vsel %vm454_vm13, 1.0, %v1587_v39  ;;  %v442_v51 = vsel %vm441_vm14, 1.0, %v1587_v39  ;;  %vm467_vm15 = vcmp.ge.s32.totalorder %v1820_v38, %v466_v49 }
 0x409   : > { %v456_v52 = vsel %vm264_vm0, %v455_v50, 0.0  ;;  %v443_v53 = vsel %vm264_vm0, %v442_v51, 0.0  ;;  %v468_v54 = vsel %vm467_vm15, 1.0, %v1587_v39 }
 0x40a   : > { %457 = vadd.xlane.f32.xlu0 %v456_v52  ;;  %444 = vadd.xlane.f32.xlu1 %v443_v53  ;;  %v469_v55 = vsel %vm264_vm0, %v468_v54, 0.0 }
 0x40e   : > { %470 = vadd.xlane.f32.xlu1 %v469_v55 }
 0x493   : > { %v458_v56 = vpop.xlane.xlu0 %457  ;;  %v445_v57 = vpop.xlane.xlu1 %444 }
 0x494   : > { %v459_v58 = vrot.slane %v458_v56, 4  ;;  %v446_v59 = vrot.slane %v445_v57, 4 }
 0x496   : > { %v460_v60 = vadd.f32 %v459_v58, %v458_v56  ;;  %v447_v61 = vadd.f32 %v446_v59, %v445_v57 }
 0x497   : > { %v471_v62 = vpop.xlane.xlu1 %470 }
 0x498   : > { %v461_v63 = vrot.slane %v460_v60, 2  ;;  %v448_v0 = vrot.slane %v447_v61, 2  ;;  %v472_v1 = vrot.slane %v471_v62, 4 }
 0x49a   : > { %v473_v2 = vadd.f32 %v472_v1, %v471_v62  ;;  %v449_v3 = vadd.f32 %v448_v0, %v447_v61  ;;  %v462_v4 = vadd.f32 %v461_v63, %v460_v60 }
 0x49c   : > { %v474_v5 = vrot.slane %v473_v2, 2  ;;  %v450_v6 = vrot.slane %v449_v3, 1  ;;  %v463_v7 = vrot.slane %v462_v4, 1 }
 0x49e   : > { %v451_v8 = vadd.f32 %v450_v6, %v449_v3  ;;  %v464_v9 = vadd.f32 %v463_v7, %v462_v4  ;;  %v475_v10 = vadd.f32 %v474_v5, %v473_v2 }
 0x4a0   : > { %1275 = vpush %v451_v8  ;;  %v476_v11 = vrot.slane %v475_v10, 1 }
 0x4a1   : > { %1277 = vpush %v464_v9 }
 0x4a2   : > { %v477_v12 = vadd.f32 %v476_v11, %v475_v10 }
 0x4a4   : > { %1279 = vpush %v477_v12 }
 0x4d1   : > { %s1276_s25 = spop %1275 }
 0x4d2   : > { %p481_p5 = scmp.ge.f32.partialorder %s1276_s25, %s2370_s6  ;;  %s1278_s7 = spop %1277 }
 0x4d3   : > { %p480_p7 = scmp.ge.f32.partialorder %s1278_s7, %s2370_s6 }
 0x4d4   : > { %s2384_s28 = smov (!%p481_p5, %s437_s28), %s2382_s26 }
 0x4d5   : > { %s1280_s4 = spop %1279  ;;  %s2386_s10 = smov (!%p480_p7, %s438_s10), %s2384_s28 }
 0x4d6   : > { %p479_p2 = scmp.ge.f32.partialorder %s1280_s4, %s2370_s6 }
 0x4d8   : > { %s2388_s8 = smov (!%p479_p2, %s439_s8), %s2386_s10 }
 0x4d9   : > { %s486_s22 = sor.u32 8388608, %s2388_s8  ;;  %s485_s9 = sor.u32 4194304, %s2388_s8 }
 0x4da   : > { %v501_v13 = vstv %s486_s22  ;;  %v488_v14 = vstv %s485_s9  ;;  %s487_s11 = sor.u32 12582912, %s2388_s8 }
 0x4db   : > { %vm502_vm1 = vcmp.ge.s32.totalorder %v1820_v38, %v501_v13  ;;  %vm489_vm2 = vcmp.ge.s32.totalorder %v1820_v38, %v488_v14  ;;  %v514_v15 = vstv %s487_s11 }
 0x4dc   : > { %v503_v16 = vsel %vm502_vm1, 1.0, %v1587_v39  ;;  %v490_v17 = vsel %vm489_vm2, 1.0, %v1587_v39  ;;  %vm515_vm3 = vcmp.ge.s32.totalorder %v1820_v38, %v514_v15 }
 0x4dd   : > { %v504_v18 = vsel %vm264_vm0, %v503_v16, 0.0  ;;  %v491_v19 = vsel %vm264_vm0, %v490_v17, 0.0  ;;  %v516_v20 = vsel %vm515_vm3, 1.0, %v1587_v39 }
 0x4de   : > { %505 = vadd.xlane.f32.xlu1 %v504_v18  ;;  %492 = vadd.xlane.f32.xlu0 %v491_v19  ;;  %v517_v21 = vsel %vm264_vm0, %v516_v20, 0.0 }
 0x4e2   : > { %518 = vadd.xlane.f32.xlu0 %v517_v21 }
 0x567   : > { %v506_v22 = vpop.xlane.xlu1 %505  ;;  %v493_v23 = vpop.xlane.xlu0 %492 }
 0x568   : > { %v507_v24 = vrot.slane %v506_v22, 4  ;;  %v494_v25 = vrot.slane %v493_v23, 4 }
 0x56a   : > { %v508_v26 = vadd.f32 %v507_v24, %v506_v22  ;;  %v495_v27 = vadd.f32 %v494_v25, %v493_v23 }
 0x56b   : > { %v519_v28 = vpop.xlane.xlu0 %518 }
 0x56c   : > { %v509_v29 = vrot.slane %v508_v26, 2  ;;  %v496_v30 = vrot.slane %v495_v27, 2  ;;  %v520_v31 = vrot.slane %v519_v28, 4 }
 0x56e   : > { %v521_v32 = vadd.f32 %v520_v31, %v519_v28  ;;  %v497_v33 = vadd.f32 %v496_v30, %v495_v27  ;;  %v510_v34 = vadd.f32 %v509_v29, %v508_v26 }
 0x570   : > { %v522_v35 = vrot.slane %v521_v32, 2  ;;  %v498_v36 = vrot.slane %v497_v33, 1  ;;  %v511_v37 = vrot.slane %v510_v34, 1 }
 0x572   : > { %v499_v40 = vadd.f32 %v498_v36, %v497_v33  ;;  %v512_v41 = vadd.f32 %v511_v37, %v510_v34  ;;  %v523_v42 = vadd.f32 %v522_v35, %v521_v32 }
 0x574   : > { %1281 = vpush %v499_v40  ;;  %v524_v43 = vrot.slane %v523_v42, 1 }
 0x575   : > { %1283 = vpush %v512_v41 }
 0x576   : > { %v525_v44 = vadd.f32 %v524_v43, %v523_v42 }
 0x578   : > { %1285 = vpush %v525_v44 }
 0x5a5   : > { %s1282_s1 = spop %1281 }
 0x5a6   : > { %p529_p13 = scmp.ge.f32.partialorder %s1282_s1, %s2370_s6  ;;  %s1284_s19 = spop %1283 }
 0x5a7   : > { %p528_p6 = scmp.ge.f32.partialorder %s1284_s19, %s2370_s6 }
 0x5a8   : > { %s2390_s9 = smov (!%p529_p13, %s485_s9), %s2388_s8 }
 0x5a9   : > { %s1286_s30 = spop %1285  ;;  %s2392_s22 = smov (!%p528_p6, %s486_s22), %s2390_s9 }
 0x5aa   : > { %p527_p8 = scmp.ge.f32.partialorder %s1286_s30, %s2370_s6 }
 0x5ac   : > { %s2394_s11 = smov (!%p527_p8, %s487_s11), %s2392_s22 }
 0x5ad   : > { %s534_s26 = sor.u32 2097152, %s2394_s11  ;;  %s533_s27 = sor.u32 1048576, %s2394_s11 }
 0x5ae   : > { %v549_v45 = vstv %s534_s26  ;;  %v536_v46 = vstv %s533_s27  ;;  %s535_s17 = sor.u32 3145728, %s2394_s11 }
 0x5af   : > { %vm550_vm4 = vcmp.ge.s32.totalorder %v1820_v38, %v549_v45  ;;  %vm537_vm5 = vcmp.ge.s32.totalorder %v1820_v38, %v536_v46  ;;  %v562_v47 = vstv %s535_s17 }
 0x5b0   : > { %v551_v48 = vsel %vm550_vm4, 1.0, %v1587_v39  ;;  %v538_v49 = vsel %vm537_vm5, 1.0, %v1587_v39  ;;  %vm563_vm6 = vcmp.ge.s32.totalorder %v1820_v38, %v562_v47 }
 0x5b1   : > { %v552_v50 = vsel %vm264_vm0, %v551_v48, 0.0  ;;  %v539_v51 = vsel %vm264_vm0, %v538_v49, 0.0  ;;  %v564_v52 = vsel %vm563_vm6, 1.0, %v1587_v39 }
 0x5b2   : > { %553 = vadd.xlane.f32.xlu0 %v552_v50  ;;  %540 = vadd.xlane.f32.xlu1 %v539_v51  ;;  %v565_v53 = vsel %vm264_vm0, %v564_v52, 0.0 }
 0x5b6   : > { %566 = vadd.xlane.f32.xlu1 %v565_v53 }
 0x63b   : > { %v554_v54 = vpop.xlane.xlu0 %553  ;;  %v541_v55 = vpop.xlane.xlu1 %540 }
 0x63c   : > { %v555_v56 = vrot.slane %v554_v54, 4  ;;  %v542_v57 = vrot.slane %v541_v55, 4 }
 0x63e   : > { %v556_v58 = vadd.f32 %v555_v56, %v554_v54  ;;  %v543_v59 = vadd.f32 %v542_v57, %v541_v55 }
 0x63f   : > { %v567_v60 = vpop.xlane.xlu1 %566 }
 0x640   : > { %v557_v61 = vrot.slane %v556_v58, 2  ;;  %v544_v62 = vrot.slane %v543_v59, 2  ;;  %v568_v63 = vrot.slane %v567_v60, 4 }
 0x642   : > { %v569_v0 = vadd.f32 %v568_v63, %v567_v60  ;;  %v545_v1 = vadd.f32 %v544_v62, %v543_v59  ;;  %v558_v2 = vadd.f32 %v557_v61, %v556_v58 }
 0x644   : > { %v570_v3 = vrot.slane %v569_v0, 2  ;;  %v546_v4 = vrot.slane %v545_v1, 1  ;;  %v559_v5 = vrot.slane %v558_v2, 1 }
 0x646   : > { %v547_v6 = vadd.f32 %v546_v4, %v545_v1  ;;  %v560_v7 = vadd.f32 %v559_v5, %v558_v2  ;;  %v571_v8 = vadd.f32 %v570_v3, %v569_v0 }
 0x648   : > { %1287 = vpush %v547_v6  ;;  %v572_v9 = vrot.slane %v571_v8, 1 }
 0x649   : > { %1289 = vpush %v560_v7 }
 0x64a   : > { %v573_v10 = vadd.f32 %v572_v9, %v571_v8 }
 0x64c   : > { %1291 = vpush %v573_v10 }
 0x679   : > { %s1288_s20 = spop %1287 }
 0x67a   : > { %p577_p1 = scmp.ge.f32.partialorder %s1288_s20, %s2370_s6  ;;  %s1290_s10 = spop %1289 }
 0x67b   : > { %p576_p3 = scmp.ge.f32.partialorder %s1290_s10, %s2370_s6 }
 0x67c   : > { %s2396_s27 = smov (!%p577_p1, %s533_s27), %s2394_s11 }
 0x67d   : > { %s1292_s28 = spop %1291  ;;  %s2398_s26 = smov (!%p576_p3, %s534_s26), %s2396_s27 }
 0x67e   : > { %p575_p9 = scmp.ge.f32.partialorder %s1292_s28, %s2370_s6 }
 0x680   : > { %s2400_s17 = smov (!%p575_p9, %s535_s17), %s2398_s26 }
 0x681   : > { %s582_s8 = sor.u32 524288, %s2400_s17  ;;  %s581_s25 = sor.u32 262144, %s2400_s17 }
 0x682   : > { %v597_v11 = vstv %s582_s8  ;;  %v584_v12 = vstv %s581_s25  ;;  %s583_s7 = sor.u32 786432, %s2400_s17 }
 0x683   : > { %vm598_vm7 = vcmp.ge.s32.totalorder %v1820_v38, %v597_v11  ;;  %vm585_vm8 = vcmp.ge.s32.totalorder %v1820_v38, %v584_v12  ;;  %v610_v13 = vstv %s583_s7 }
 0x684   : > { %v599_v14 = vsel %vm598_vm7, 1.0, %v1587_v39  ;;  %v586_v15 = vsel %vm585_vm8, 1.0, %v1587_v39  ;;  %vm611_vm9 = vcmp.ge.s32.totalorder %v1820_v38, %v610_v13 }
 0x685   : > { %v600_v16 = vsel %vm264_vm0, %v599_v14, 0.0  ;;  %v587_v17 = vsel %vm264_vm0, %v586_v15, 0.0  ;;  %v612_v18 = vsel %vm611_vm9, 1.0, %v1587_v39 }
 0x686   : > { %601 = vadd.xlane.f32.xlu1 %v600_v16  ;;  %588 = vadd.xlane.f32.xlu0 %v587_v17  ;;  %v613_v19 = vsel %vm264_vm0, %v612_v18, 0.0 }
 0x68a   : > { %614 = vadd.xlane.f32.xlu0 %v613_v19 }
 0x70f   : > { %v602_v20 = vpop.xlane.xlu1 %601  ;;  %v589_v21 = vpop.xlane.xlu0 %588 }
 0x710   : > { %v603_v22 = vrot.slane %v602_v20, 4  ;;  %v590_v23 = vrot.slane %v589_v21, 4 }
 0x712   : > { %v604_v24 = vadd.f32 %v603_v22, %v602_v20  ;;  %v591_v25 = vadd.f32 %v590_v23, %v589_v21 }
 0x713   : > { %v615_v26 = vpop.xlane.xlu0 %614 }
 0x714   : > { %v605_v27 = vrot.slane %v604_v24, 2  ;;  %v592_v28 = vrot.slane %v591_v25, 2  ;;  %v616_v29 = vrot.slane %v615_v26, 4 }
 0x716   : > { %v617_v30 = vadd.f32 %v616_v29, %v615_v26  ;;  %v593_v31 = vadd.f32 %v592_v28, %v591_v25  ;;  %v606_v32 = vadd.f32 %v605_v27, %v604_v24 }
 0x718   : > { %v618_v33 = vrot.slane %v617_v30, 2  ;;  %v594_v34 = vrot.slane %v593_v31, 1  ;;  %v607_v35 = vrot.slane %v606_v32, 1 }
 0x71a   : > { %v595_v36 = vadd.f32 %v594_v34, %v593_v31  ;;  %v608_v37 = vadd.f32 %v607_v35, %v606_v32  ;;  %v619_v40 = vadd.f32 %v618_v33, %v617_v30 }
 0x71c   : > { %1293 = vpush %v595_v36  ;;  %v620_v41 = vrot.slane %v619_v40, 1 }
 0x71d   : > { %1295 = vpush %v608_v37 }
 0x71e   : > { %v621_v42 = vadd.f32 %v620_v41, %v619_v40 }
 0x720   : > { %1297 = vpush %v621_v42 }
 0x74d   : > { %s1294_s4 = spop %1293 }
 0x74e   : > { %p625_p0 = scmp.ge.f32.partialorder %s1294_s4, %s2370_s6  ;;  %s1296_s22 = spop %1295 }
 0x74f   : > { %p624_p11 = scmp.ge.f32.partialorder %s1296_s22, %s2370_s6 }
 0x750   : > { %s2402_s25 = smov (!%p625_p0, %s581_s25), %s2400_s17 }
 0x751   : > { %s1298_s9 = spop %1297  ;;  %s2404_s8 = smov (!%p624_p11, %s582_s8), %s2402_s25 }
 0x752   : > { %p623_p12 = scmp.ge.f32.partialorder %s1298_s9, %s2370_s6 }
 0x754   : > { %s2406_s7 = smov (!%p623_p12, %s583_s7), %s2404_s8 }
 0x755   : > { %s630_s11 = sor.u32 131072, %s2406_s7  ;;  %s629_s1 = sor.u32 65536, %s2406_s7 }
 0x756   : > { %v645_v43 = vstv %s630_s11  ;;  %v632_v44 = vstv %s629_s1  ;;  %s631_s19 = sor.u32 196608, %s2406_s7 }
 0x757   : > { %vm646_vm10 = vcmp.ge.s32.totalorder %v1820_v38, %v645_v43  ;;  %vm633_vm11 = vcmp.ge.s32.totalorder %v1820_v38, %v632_v44  ;;  %v658_v45 = vstv %s631_s19 }
 0x758   : > { %v647_v46 = vsel %vm646_vm10, 1.0, %v1587_v39  ;;  %v634_v47 = vsel %vm633_vm11, 1.0, %v1587_v39  ;;  %vm659_vm12 = vcmp.ge.s32.totalorder %v1820_v38, %v658_v45 }
 0x759   : > { %v648_v48 = vsel %vm264_vm0, %v647_v46, 0.0  ;;  %v635_v49 = vsel %vm264_vm0, %v634_v47, 0.0  ;;  %v660_v50 = vsel %vm659_vm12, 1.0, %v1587_v39 }
 0x75a   : > { %649 = vadd.xlane.f32.xlu0 %v648_v48  ;;  %636 = vadd.xlane.f32.xlu1 %v635_v49  ;;  %v661_v51 = vsel %vm264_vm0, %v660_v50, 0.0 }
 0x75e   : > { %662 = vadd.xlane.f32.xlu1 %v661_v51 }
 0x7e3   : > { %v650_v52 = vpop.xlane.xlu0 %649  ;;  %v637_v53 = vpop.xlane.xlu1 %636 }
 0x7e4   : > { %v651_v54 = vrot.slane %v650_v52, 4  ;;  %v638_v55 = vrot.slane %v637_v53, 4 }
 0x7e6   : > { %v652_v56 = vadd.f32 %v651_v54, %v650_v52  ;;  %v639_v57 = vadd.f32 %v638_v55, %v637_v53 }
 0x7e7   : > { %v663_v58 = vpop.xlane.xlu1 %662 }
 0x7e8   : > { %v653_v59 = vrot.slane %v652_v56, 2  ;;  %v640_v60 = vrot.slane %v639_v57, 2  ;;  %v664_v61 = vrot.slane %v663_v58, 4 }
 0x7ea   : > { %v665_v62 = vadd.f32 %v664_v61, %v663_v58  ;;  %v641_v63 = vadd.f32 %v640_v60, %v639_v57  ;;  %v654_v0 = vadd.f32 %v653_v59, %v652_v56 }
 0x7ec   : > { %v666_v1 = vrot.slane %v665_v62, 2  ;;  %v642_v2 = vrot.slane %v641_v63, 1  ;;  %v655_v3 = vrot.slane %v654_v0, 1 }
 0x7ee   : > { %v643_v4 = vadd.f32 %v642_v2, %v641_v63  ;;  %v656_v5 = vadd.f32 %v655_v3, %v654_v0  ;;  %v667_v6 = vadd.f32 %v666_v1, %v665_v62 }
 0x7f0   : > { %1299 = vpush %v643_v4  ;;  %v668_v7 = vrot.slane %v667_v6, 1 }
 0x7f1   : > { %1301 = vpush %v656_v5 }
 0x7f2   : > { %v669_v8 = vadd.f32 %v668_v7, %v667_v6 }
 0x7f4   : > { %1303 = vpush %v669_v8 }
 0x821   : > { %s1300_s30 = spop %1299 }
 0x822   : > { %p673_p4 = scmp.ge.f32.partialorder %s1300_s30, %s2370_s6  ;;  %s1302_s26 = spop %1301 }
 0x823   : > { %p672_p5 = scmp.ge.f32.partialorder %s1302_s26, %s2370_s6 }
 0x824   : > { %s2408_s1 = smov (!%p673_p4, %s629_s1), %s2406_s7 }
 0x825   : > { %s1304_s27 = spop %1303  ;;  %s2410_s11 = smov (!%p672_p5, %s630_s11), %s2408_s1 }
 0x826   : > { %p671_p7 = scmp.ge.f32.partialorder %s1304_s27, %s2370_s6 }
 0x828   : > { %s2412_s19 = smov (!%p671_p7, %s631_s19), %s2410_s11 }
 0x829   : > { %s678_s17 = sor.u32 32768, %s2412_s19  ;;  %s677_s20 = sor.u32 16384, %s2412_s19 }
 0x82a   : > { %v693_v9 = vstv %s678_s17  ;;  %v680_v10 = vstv %s677_s20  ;;  %s679_s10 = sor.u32 49152, %s2412_s19 }
 0x82b   : > { %vm694_vm13 = vcmp.ge.s32.totalorder %v1820_v38, %v693_v9  ;;  %vm681_vm14 = vcmp.ge.s32.totalorder %v1820_v38, %v680_v10  ;;  %v706_v11 = vstv %s679_s10 }
 0x82c   : > { %v695_v12 = vsel %vm694_vm13, 1.0, %v1587_v39  ;;  %v682_v13 = vsel %vm681_vm14, 1.0, %v1587_v39  ;;  %vm707_vm15 = vcmp.ge.s32.totalorder %v1820_v38, %v706_v11 }
 0x82d   : > { %v696_v14 = vsel %vm264_vm0, %v695_v12, 0.0  ;;  %v683_v15 = vsel %vm264_vm0, %v682_v13, 0.0  ;;  %v708_v16 = vsel %vm707_vm15, 1.0, %v1587_v39 }
 0x82e   : > { %697 = vadd.xlane.f32.xlu1 %v696_v14  ;;  %684 = vadd.xlane.f32.xlu0 %v683_v15  ;;  %v709_v17 = vsel %vm264_vm0, %v708_v16, 0.0 }
 0x832   : > { %710 = vadd.xlane.f32.xlu0 %v709_v17 }
 0x8b7   : > { %v698_v18 = vpop.xlane.xlu1 %697  ;;  %v685_v19 = vpop.xlane.xlu0 %684 }
 0x8b8   : > { %v699_v20 = vrot.slane %v698_v18, 4  ;;  %v686_v21 = vrot.slane %v685_v19, 4 }
 0x8ba   : > { %v700_v22 = vadd.f32 %v699_v20, %v698_v18  ;;  %v687_v23 = vadd.f32 %v686_v21, %v685_v19 }
 0x8bb   : > { %v711_v24 = vpop.xlane.xlu0 %710 }
 0x8bc   : > { %v701_v25 = vrot.slane %v700_v22, 2  ;;  %v688_v26 = vrot.slane %v687_v23, 2  ;;  %v712_v27 = vrot.slane %v711_v24, 4 }
 0x8be   : > { %v713_v28 = vadd.f32 %v712_v27, %v711_v24  ;;  %v689_v29 = vadd.f32 %v688_v26, %v687_v23  ;;  %v702_v30 = vadd.f32 %v701_v25, %v700_v22 }
 0x8c0   : > { %v714_v31 = vrot.slane %v713_v28, 2  ;;  %v690_v32 = vrot.slane %v689_v29, 1  ;;  %v703_v33 = vrot.slane %v702_v30, 1 }
 0x8c2   : > { %v691_v34 = vadd.f32 %v690_v32, %v689_v29  ;;  %v704_v35 = vadd.f32 %v703_v33, %v702_v30  ;;  %v715_v36 = vadd.f32 %v714_v31, %v713_v28 }
 0x8c4   : > { %1305 = vpush %v691_v34  ;;  %v716_v37 = vrot.slane %v715_v36, 1 }
 0x8c5   : > { %1307 = vpush %v704_v35 }
 0x8c6   : > { %v717_v40 = vadd.f32 %v716_v37, %v715_v36 }
 0x8c8   : > { %1309 = vpush %v717_v40 }
 0x8f5   : > { %s1306_s28 = spop %1305 }
 0x8f6   : > { %p721_p2 = scmp.ge.f32.partialorder %s1306_s28, %s2370_s6  ;;  %s1308_s8 = spop %1307 }
 0x8f7   : > { %p720_p13 = scmp.ge.f32.partialorder %s1308_s8, %s2370_s6 }
 0x8f8   : > { %s2414_s20 = smov (!%p721_p2, %s677_s20), %s2412_s19 }
 0x8f9   : > { %s1310_s25 = spop %1309  ;;  %s2416_s17 = smov (!%p720_p13, %s678_s17), %s2414_s20 }
 0x8fa   : > { %p719_p6 = scmp.ge.f32.partialorder %s1310_s25, %s2370_s6 }
 0x8fc   : > { %s2418_s10 = smov (!%p719_p6, %s679_s10), %s2416_s17 }
 0x8fd   : > { %s726_s7 = sor.u32 8192, %s2418_s10  ;;  %s725_s4 = sor.u32 4096, %s2418_s10 }
 0x8fe   : > { %v741_v41 = vstv %s726_s7  ;;  %v728_v42 = vstv %s725_s4  ;;  %s727_s22 = sor.u32 12288, %s2418_s10 }
 0x8ff   : > { %vm742_vm1 = vcmp.ge.s32.totalorder %v1820_v38, %v741_v41  ;;  %vm729_vm2 = vcmp.ge.s32.totalorder %v1820_v38, %v728_v42  ;;  %v754_v43 = vstv %s727_s22 }
 0x900   : > { %v743_v44 = vsel %vm742_vm1, 1.0, %v1587_v39  ;;  %v730_v45 = vsel %vm729_vm2, 1.0, %v1587_v39  ;;  %vm755_vm3 = vcmp.ge.s32.totalorder %v1820_v38, %v754_v43 }
 0x901   : > { %v744_v46 = vsel %vm264_vm0, %v743_v44, 0.0  ;;  %v731_v47 = vsel %vm264_vm0, %v730_v45, 0.0  ;;  %v756_v48 = vsel %vm755_vm3, 1.0, %v1587_v39 }
 0x902   : > { %745 = vadd.xlane.f32.xlu0 %v744_v46  ;;  %732 = vadd.xlane.f32.xlu1 %v731_v47  ;;  %v757_v49 = vsel %vm264_vm0, %v756_v48, 0.0 }
 0x906   : > { %758 = vadd.xlane.f32.xlu1 %v757_v49 }
 0x98b   : > { %v746_v50 = vpop.xlane.xlu0 %745  ;;  %v733_v51 = vpop.xlane.xlu1 %732 }
 0x98c   : > { %v747_v52 = vrot.slane %v746_v50, 4  ;;  %v734_v53 = vrot.slane %v733_v51, 4 }
 0x98e   : > { %v748_v54 = vadd.f32 %v747_v52, %v746_v50  ;;  %v735_v55 = vadd.f32 %v734_v53, %v733_v51 }
 0x98f   : > { %v759_v56 = vpop.xlane.xlu1 %758 }
 0x990   : > { %v749_v57 = vrot.slane %v748_v54, 2  ;;  %v736_v58 = vrot.slane %v735_v55, 2  ;;  %v760_v59 = vrot.slane %v759_v56, 4 }
 0x992   : > { %v761_v60 = vadd.f32 %v760_v59, %v759_v56  ;;  %v737_v61 = vadd.f32 %v736_v58, %v735_v55  ;;  %v750_v62 = vadd.f32 %v749_v57, %v748_v54 }
 0x994   : > { %v762_v63 = vrot.slane %v761_v60, 2  ;;  %v738_v0 = vrot.slane %v737_v61, 1  ;;  %v751_v1 = vrot.slane %v750_v62, 1 }
 0x996   : > { %v739_v2 = vadd.f32 %v738_v0, %v737_v61  ;;  %v752_v3 = vadd.f32 %v751_v1, %v750_v62  ;;  %v763_v4 = vadd.f32 %v762_v63, %v761_v60 }
 0x998   : > { %1311 = vpush %v739_v2  ;;  %v764_v5 = vrot.slane %v763_v4, 1 }
 0x999   : > { %1313 = vpush %v752_v3 }
 0x99a   : > { %v765_v6 = vadd.f32 %v764_v5, %v763_v4 }
 0x99c   : > { %1315 = vpush %v765_v6 }
 0x9c9   : > { %s1312_s9 = spop %1311 }
 0x9ca   : > { %p769_p8 = scmp.ge.f32.partialorder %s1312_s9, %s2370_s6  ;;  %s1314_s11 = spop %1313 }
 0x9cb   : > { %p768_p1 = scmp.ge.f32.partialorder %s1314_s11, %s2370_s6 }
 0x9cc   : > { %s2420_s4 = smov (!%p769_p8, %s725_s4), %s2418_s10 }
 0x9cd   : > { %s1316_s1 = spop %1315  ;;  %s2422_s7 = smov (!%p768_p1, %s726_s7), %s2420_s4 }
 0x9ce   : > { %p767_p3 = scmp.ge.f32.partialorder %s1316_s1, %s2370_s6 }
 0x9d0   : > { %s2424_s22 = smov (!%p767_p3, %s727_s22), %s2422_s7 }
 0x9d1   : > { %s774_s19 = sor.u32 2048, %s2424_s22  ;;  %s773_s30 = sor.u32 1024, %s2424_s22 }
 0x9d2   : > { %v789_v7 = vstv %s774_s19  ;;  %v776_v8 = vstv %s773_s30  ;;  %s775_s26 = sor.u32 3072, %s2424_s22 }
 0x9d3   : > { %vm790_vm4 = vcmp.ge.s32.totalorder %v1820_v38, %v789_v7  ;;  %vm777_vm5 = vcmp.ge.s32.totalorder %v1820_v38, %v776_v8  ;;  %v802_v9 = vstv %s775_s26 }
 0x9d4   : > { %v791_v10 = vsel %vm790_vm4, 1.0, %v1587_v39  ;;  %v778_v11 = vsel %vm777_vm5, 1.0, %v1587_v39  ;;  %vm803_vm6 = vcmp.ge.s32.totalorder %v1820_v38, %v802_v9 }
 0x9d5   : > { %v792_v12 = vsel %vm264_vm0, %v791_v10, 0.0  ;;  %v779_v13 = vsel %vm264_vm0, %v778_v11, 0.0  ;;  %v804_v14 = vsel %vm803_vm6, 1.0, %v1587_v39 }
 0x9d6   : > { %793 = vadd.xlane.f32.xlu1 %v792_v12  ;;  %780 = vadd.xlane.f32.xlu0 %v779_v13  ;;  %v805_v15 = vsel %vm264_vm0, %v804_v14, 0.0 }
 0x9da   : > { %806 = vadd.xlane.f32.xlu0 %v805_v15 }
 0xa5f   : > { %v794_v16 = vpop.xlane.xlu1 %793  ;;  %v781_v17 = vpop.xlane.xlu0 %780 }
 0xa60   : > { %v795_v18 = vrot.slane %v794_v16, 4  ;;  %v782_v19 = vrot.slane %v781_v17, 4 }
 0xa62   : > { %v796_v20 = vadd.f32 %v795_v18, %v794_v16  ;;  %v783_v21 = vadd.f32 %v782_v19, %v781_v17 }
 0xa63   : > { %v807_v22 = vpop.xlane.xlu0 %806 }
 0xa64   : > { %v797_v23 = vrot.slane %v796_v20, 2  ;;  %v784_v24 = vrot.slane %v783_v21, 2  ;;  %v808_v25 = vrot.slane %v807_v22, 4 }
 0xa66   : > { %v809_v26 = vadd.f32 %v808_v25, %v807_v22  ;;  %v785_v27 = vadd.f32 %v784_v24, %v783_v21  ;;  %v798_v28 = vadd.f32 %v797_v23, %v796_v20 }
 0xa68   : > { %v810_v29 = vrot.slane %v809_v26, 2  ;;  %v786_v30 = vrot.slane %v785_v27, 1  ;;  %v799_v31 = vrot.slane %v798_v28, 1 }
 0xa6a   : > { %v787_v32 = vadd.f32 %v786_v30, %v785_v27  ;;  %v800_v33 = vadd.f32 %v799_v31, %v798_v28  ;;  %v811_v34 = vadd.f32 %v810_v29, %v809_v26 }
 0xa6c   : > { %1317 = vpush %v787_v32  ;;  %v812_v35 = vrot.slane %v811_v34, 1 }
 0xa6d   : > { %1319 = vpush %v800_v33 }
 0xa6e   : > { %v813_v36 = vadd.f32 %v812_v35, %v811_v34 }
 0xa70   : > { %1321 = vpush %v813_v36 }
 0xa9d   : > { %s1318_s27 = spop %1317 }
 0xa9e   : > { %p817_p9 = scmp.ge.f32.partialorder %s1318_s27, %s2370_s6  ;;  %s1320_s17 = spop %1319 }
 0xa9f   : > { %p816_p0 = scmp.ge.f32.partialorder %s1320_s17, %s2370_s6 }
 0xaa0   : > { %s2426_s30 = smov (!%p817_p9, %s773_s30), %s2424_s22 }
 0xaa1   : > { %s1322_s20 = spop %1321  ;;  %s2428_s19 = smov (!%p816_p0, %s774_s19), %s2426_s30 }
 0xaa2   : > { %p815_p11 = scmp.ge.f32.partialorder %s1322_s20, %s2370_s6 }
 0xaa4   : > { %s2430_s26 = smov (!%p815_p11, %s775_s26), %s2428_s19 }
 0xaa5   : > { %s822_s10 = sor.u32 512, %s2430_s26  ;;  %s821_s28 = sor.u32 256, %s2430_s26 }
 0xaa6   : > { %v837_v37 = vstv %s822_s10  ;;  %v824_v40 = vstv %s821_s28  ;;  %s823_s8 = sor.u32 768, %s2430_s26 }
 0xaa7   : > { %vm838_vm7 = vcmp.ge.s32.totalorder %v1820_v38, %v837_v37  ;;  %vm825_vm8 = vcmp.ge.s32.totalorder %v1820_v38, %v824_v40  ;;  %v850_v41 = vstv %s823_s8 }
 0xaa8   : > { %v839_v42 = vsel %vm838_vm7, 1.0, %v1587_v39  ;;  %v826_v43 = vsel %vm825_vm8, 1.0, %v1587_v39  ;;  %vm851_vm9 = vcmp.ge.s32.totalorder %v1820_v38, %v850_v41 }
 0xaa9   : > { %v840_v44 = vsel %vm264_vm0, %v839_v42, 0.0  ;;  %v827_v45 = vsel %vm264_vm0, %v826_v43, 0.0  ;;  %v852_v46 = vsel %vm851_vm9, 1.0, %v1587_v39 }
 0xaaa   : > { %841 = vadd.xlane.f32.xlu0 %v840_v44  ;;  %828 = vadd.xlane.f32.xlu1 %v827_v45  ;;  %v853_v47 = vsel %vm264_vm0, %v852_v46, 0.0 }
 0xaae   : > { %854 = vadd.xlane.f32.xlu1 %v853_v47 }
 0xb33   : > { %v842_v48 = vpop.xlane.xlu0 %841  ;;  %v829_v49 = vpop.xlane.xlu1 %828 }
 0xb34   : > { %v843_v50 = vrot.slane %v842_v48, 4  ;;  %v830_v51 = vrot.slane %v829_v49, 4 }
 0xb36   : > { %v844_v52 = vadd.f32 %v843_v50, %v842_v48  ;;  %v831_v53 = vadd.f32 %v830_v51, %v829_v49 }
 0xb37   : > { %v855_v54 = vpop.xlane.xlu1 %854 }
 0xb38   : > { %v845_v55 = vrot.slane %v844_v52, 2  ;;  %v832_v56 = vrot.slane %v831_v53, 2  ;;  %v856_v57 = vrot.slane %v855_v54, 4 }
 0xb3a   : > { %v857_v58 = vadd.f32 %v856_v57, %v855_v54  ;;  %v833_v59 = vadd.f32 %v832_v56, %v831_v53  ;;  %v846_v60 = vadd.f32 %v845_v55, %v844_v52 }
 0xb3c   : > { %v858_v61 = vrot.slane %v857_v58, 2  ;;  %v834_v62 = vrot.slane %v833_v59, 1  ;;  %v847_v63 = vrot.slane %v846_v60, 1 }
 0xb3e   : > { %v835_v0 = vadd.f32 %v834_v62, %v833_v59  ;;  %v848_v1 = vadd.f32 %v847_v63, %v846_v60  ;;  %v859_v2 = vadd.f32 %v858_v61, %v857_v58 }
 0xb40   : > { %1323 = vpush %v835_v0  ;;  %v860_v3 = vrot.slane %v859_v2, 1 }
 0xb41   : > { %1325 = vpush %v848_v1 }
 0xb42   : > { %v861_v4 = vadd.f32 %v860_v3, %v859_v2 }
 0xb44   : > { %1327 = vpush %v861_v4 }
 0xb71   : > { %s1324_s25 = spop %1323 }
 0xb72   : > { %p865_p12 = scmp.ge.f32.partialorder %s1324_s25, %s2370_s6  ;;  %s1326_s7 = spop %1325 }
 0xb73   : > { %p864_p4 = scmp.ge.f32.partialorder %s1326_s7, %s2370_s6 }
 0xb74   : > { %s2432_s28 = smov (!%p865_p12, %s821_s28), %s2430_s26 }
 0xb75   : > { %s1328_s4 = spop %1327  ;;  %s2434_s10 = smov (!%p864_p4, %s822_s10), %s2432_s28 }
 0xb76   : > { %p863_p5 = scmp.ge.f32.partialorder %s1328_s4, %s2370_s6 }
 0xb78   : > { %s2436_s8 = smov (!%p863_p5, %s823_s8), %s2434_s10 }
 0xb79   : > { %s870_s22 = sor.u32 128, %s2436_s8  ;;  %s869_s9 = sor.u32 64, %s2436_s8 }
 0xb7a   : > { %v885_v5 = vstv %s870_s22  ;;  %v872_v6 = vstv %s869_s9  ;;  %s871_s11 = sor.u32 192, %s2436_s8 }
 0xb7b   : > { %vm886_vm10 = vcmp.ge.s32.totalorder %v1820_v38, %v885_v5  ;;  %vm873_vm11 = vcmp.ge.s32.totalorder %v1820_v38, %v872_v6  ;;  %v898_v7 = vstv %s871_s11 }
 0xb7c   : > { %v887_v8 = vsel %vm886_vm10, 1.0, %v1587_v39  ;;  %v874_v9 = vsel %vm873_vm11, 1.0, %v1587_v39  ;;  %vm899_vm12 = vcmp.ge.s32.totalorder %v1820_v38, %v898_v7 }
 0xb7d   : > { %v888_v10 = vsel %vm264_vm0, %v887_v8, 0.0  ;;  %v875_v11 = vsel %vm264_vm0, %v874_v9, 0.0  ;;  %v900_v12 = vsel %vm899_vm12, 1.0, %v1587_v39 }
 0xb7e   : > { %889 = vadd.xlane.f32.xlu1 %v888_v10  ;;  %876 = vadd.xlane.f32.xlu0 %v875_v11  ;;  %v901_v13 = vsel %vm264_vm0, %v900_v12, 0.0 }
 0xb82   : > { %902 = vadd.xlane.f32.xlu0 %v901_v13 }
 0xc07   : > { %v890_v14 = vpop.xlane.xlu1 %889  ;;  %v877_v15 = vpop.xlane.xlu0 %876 }
 0xc08   : > { %v891_v16 = vrot.slane %v890_v14, 4  ;;  %v878_v17 = vrot.slane %v877_v15, 4 }
 0xc0a   : > { %v892_v18 = vadd.f32 %v891_v16, %v890_v14  ;;  %v879_v19 = vadd.f32 %v878_v17, %v877_v15 }
 0xc0b   : > { %v903_v20 = vpop.xlane.xlu0 %902 }
 0xc0c   : > { %v893_v21 = vrot.slane %v892_v18, 2  ;;  %v880_v22 = vrot.slane %v879_v19, 2  ;;  %v904_v23 = vrot.slane %v903_v20, 4 }
 0xc0e   : > { %v905_v24 = vadd.f32 %v904_v23, %v903_v20  ;;  %v881_v25 = vadd.f32 %v880_v22, %v879_v19  ;;  %v894_v26 = vadd.f32 %v893_v21, %v892_v18 }
 0xc10   : > { %v906_v27 = vrot.slane %v905_v24, 2  ;;  %v882_v28 = vrot.slane %v881_v25, 1  ;;  %v895_v29 = vrot.slane %v894_v26, 1 }
 0xc12   : > { %v883_v30 = vadd.f32 %v882_v28, %v881_v25  ;;  %v896_v31 = vadd.f32 %v895_v29, %v894_v26  ;;  %v907_v32 = vadd.f32 %v906_v27, %v905_v24 }
 0xc14   : > { %1329 = vpush %v883_v30  ;;  %v908_v33 = vrot.slane %v907_v32, 1 }
 0xc15   : > { %1331 = vpush %v896_v31 }
 0xc16   : > { %v909_v34 = vadd.f32 %v908_v33, %v907_v32 }
 0xc18   : > { %1333 = vpush %v909_v34 }
 0xc45   : > { %s1330_s1 = spop %1329 }
 0xc46   : > { %p913_p7 = scmp.ge.f32.partialorder %s1330_s1, %s2370_s6  ;;  %s1332_s19 = spop %1331 }
 0xc47   : > { %p912_p2 = scmp.ge.f32.partialorder %s1332_s19, %s2370_s6 }
 0xc48   : > { %s2438_s9 = smov (!%p913_p7, %s869_s9), %s2436_s8 }
 0xc49   : > { %s1334_s30 = spop %1333  ;;  %s2440_s22 = smov (!%p912_p2, %s870_s22), %s2438_s9 }
 0xc4a   : > { %p911_p13 = scmp.ge.f32.partialorder %s1334_s30, %s2370_s6 }
 0xc4c   : > { %s2442_s11 = smov (!%p911_p13, %s871_s11), %s2440_s22 }
 0xc4d   : > { %s918_s26 = sor.u32 32, %s2442_s11  ;;  %s917_s27 = sor.u32 16, %s2442_s11 }
 0xc4e   : > { %v933_v35 = vstv %s918_s26  ;;  %v920_v36 = vstv %s917_s27  ;;  %s919_s17 = sor.u32 48, %s2442_s11 }
 0xc4f   : > { %vm934_vm13 = vcmp.ge.s32.totalorder %v1820_v38, %v933_v35  ;;  %vm921_vm14 = vcmp.ge.s32.totalorder %v1820_v38, %v920_v36  ;;  %v946_v37 = vstv %s919_s17 }
 0xc50   : > { %v935_v40 = vsel %vm934_vm13, 1.0, %v1587_v39  ;;  %v922_v41 = vsel %vm921_vm14, 1.0, %v1587_v39  ;;  %vm947_vm15 = vcmp.ge.s32.totalorder %v1820_v38, %v946_v37 }
 0xc51   : > { %v936_v42 = vsel %vm264_vm0, %v935_v40, 0.0  ;;  %v923_v43 = vsel %vm264_vm0, %v922_v41, 0.0  ;;  %v948_v44 = vsel %vm947_vm15, 1.0, %v1587_v39 }
 0xc52   : > { %937 = vadd.xlane.f32.xlu0 %v936_v42  ;;  %924 = vadd.xlane.f32.xlu1 %v923_v43  ;;  %v949_v45 = vsel %vm264_vm0, %v948_v44, 0.0 }
 0xc56   : > { %950 = vadd.xlane.f32.xlu1 %v949_v45 }
 0xcdb   : > { %v938_v46 = vpop.xlane.xlu0 %937  ;;  %v925_v47 = vpop.xlane.xlu1 %924 }
 0xcdc   : > { %v939_v48 = vrot.slane %v938_v46, 4  ;;  %v926_v49 = vrot.slane %v925_v47, 4 }
 0xcde   : > { %v940_v50 = vadd.f32 %v939_v48, %v938_v46  ;;  %v927_v51 = vadd.f32 %v926_v49, %v925_v47 }
 0xcdf   : > { %v951_v52 = vpop.xlane.xlu1 %950 }
 0xce0   : > { %v941_v53 = vrot.slane %v940_v50, 2  ;;  %v928_v54 = vrot.slane %v927_v51, 2  ;;  %v952_v55 = vrot.slane %v951_v52, 4 }
 0xce2   : > { %v953_v56 = vadd.f32 %v952_v55, %v951_v52  ;;  %v929_v57 = vadd.f32 %v928_v54, %v927_v51  ;;  %v942_v58 = vadd.f32 %v941_v53, %v940_v50 }
 0xce4   : > { %v954_v59 = vrot.slane %v953_v56, 2  ;;  %v930_v60 = vrot.slane %v929_v57, 1  ;;  %v943_v61 = vrot.slane %v942_v58, 1 }
 0xce6   : > { %v931_v62 = vadd.f32 %v930_v60, %v929_v57  ;;  %v944_v63 = vadd.f32 %v943_v61, %v942_v58  ;;  %v955_v0 = vadd.f32 %v954_v59, %v953_v56 }
 0xce8   : > { %1335 = vpush %v931_v62  ;;  %v956_v1 = vrot.slane %v955_v0, 1 }
 0xce9   : > { %1337 = vpush %v944_v63 }
 0xcea   : > { %v957_v2 = vadd.f32 %v956_v1, %v955_v0 }
 0xcec   : > { %1339 = vpush %v957_v2 }
 0xd19   : > { %s1336_s20 = spop %1335 }
 0xd1a   : > { %p961_p6 = scmp.ge.f32.partialorder %s1336_s20, %s2370_s6  ;;  %s1338_s10 = spop %1337 }
 0xd1b   : > { %p960_p8 = scmp.ge.f32.partialorder %s1338_s10, %s2370_s6 }
 0xd1c   : > { %s2444_s27 = smov (!%p961_p6, %s917_s27), %s2442_s11 }
 0xd1d   : > { %s1340_s28 = spop %1339  ;;  %s2446_s26 = smov (!%p960_p8, %s918_s26), %s2444_s27 }
 0xd1e   : > { %p959_p1 = scmp.ge.f32.partialorder %s1340_s28, %s2370_s6 }
 0xd20   : > { %s2448_s17 = smov (!%p959_p1, %s919_s17), %s2446_s26 }
 0xd21   : > { %s966_s8 = sor.u32 8, %s2448_s17  ;;  %s965_s25 = sor.u32 4, %s2448_s17 }
 0xd22   : > { %v981_v3 = vstv %s966_s8  ;;  %v968_v4 = vstv %s965_s25  ;;  %s967_s7 = sor.u32 12, %s2448_s17 }
 0xd23   : > { %vm982_vm1 = vcmp.ge.s32.totalorder %v1820_v38, %v981_v3  ;;  %vm969_vm2 = vcmp.ge.s32.totalorder %v1820_v38, %v968_v4  ;;  %v994_v5 = vstv %s967_s7 }
 0xd24   : > { %v983_v6 = vsel %vm982_vm1, 1.0, %v1587_v39  ;;  %v970_v7 = vsel %vm969_vm2, 1.0, %v1587_v39  ;;  %vm995_vm3 = vcmp.ge.s32.totalorder %v1820_v38, %v994_v5 }
 0xd25   : > { %v984_v8 = vsel %vm264_vm0, %v983_v6, 0.0  ;;  %v971_v9 = vsel %vm264_vm0, %v970_v7, 0.0  ;;  %v996_v10 = vsel %vm995_vm3, 1.0, %v1587_v39 }
 0xd26   : > { %985 = vadd.xlane.f32.xlu1 %v984_v8  ;;  %972 = vadd.xlane.f32.xlu0 %v971_v9  ;;  %v997_v11 = vsel %vm264_vm0, %v996_v10, 0.0  ;;  %v1100_v8 = vstv %s2370_s6 }
 0xd27   : > { %1425 = vrcp.f32 %v1100_v8 }
 0xd2a   : > { %998 = vadd.xlane.f32.xlu0 %v997_v11 }
 0xdaf   : > { %v986_v12 = vpop.xlane.xlu1 %985  ;;  %v973_v13 = vpop.xlane.xlu0 %972 }
 0xdb0   : > { %v987_v14 = vrot.slane %v986_v12, 4  ;;  %v974_v15 = vrot.slane %v973_v13, 4 }
 0xdb2   : > { %v988_v16 = vadd.f32 %v987_v14, %v986_v12  ;;  %v975_v17 = vadd.f32 %v974_v15, %v973_v13 }
 0xdb3   : > { %v999_v18 = vpop.xlane.xlu0 %998 }
 0xdb4   : > { %v989_v19 = vrot.slane %v988_v16, 2  ;;  %v976_v20 = vrot.slane %v975_v17, 2  ;;  %v1000_v21 = vrot.slane %v999_v18, 4 }
 0xdb6   : > { %v1001_v22 = vadd.f32 %v1000_v21, %v999_v18  ;;  %v977_v23 = vadd.f32 %v976_v20, %v975_v17  ;;  %v990_v24 = vadd.f32 %v989_v19, %v988_v16 }
 0xdb8   : > { %v1002_v25 = vrot.slane %v1001_v22, 2  ;;  %v978_v26 = vrot.slane %v977_v23, 1  ;;  %v991_v27 = vrot.slane %v990_v24, 1 }
 0xdba   : > { %v979_v28 = vadd.f32 %v978_v26, %v977_v23  ;;  %v992_v29 = vadd.f32 %v991_v27, %v990_v24  ;;  %v1003_v30 = vadd.f32 %v1002_v25, %v1001_v22  ;;  %v1426_v27 = vpop.eup %1425 }
 0xdbc   : > { %1341 = vpush %v979_v28  ;;  %v1004_v31 = vrot.slane %v1003_v30, 1 }
 0xdbd   : > { %1343 = vpush %v992_v29 }
 0xdbe   : > { %v1005_v32 = vadd.f32 %v1004_v31, %v1003_v30 }
 0xdc0   : > { %1345 = vpush %v1005_v32 }
 0xded   : > { %s1342_s4 = spop %1341 }
 0xdee   : > { %p1009_p3 = scmp.ge.f32.partialorder %s1342_s4, %s2370_s6  ;;  %s1344_s22 = spop %1343 }
 0xdef   : > { %p1008_p9 = scmp.ge.f32.partialorder %s1344_s22, %s2370_s6 }
 0xdf0   : > { %s2450_s25 = smov (!%p1009_p3, %s965_s25), %s2448_s17 }
 0xdf1   : > { %s1346_s9 = spop %1345  ;;  %s2452_s8 = smov (!%p1008_p9, %s966_s8), %s2450_s25 }
 0xdf2   : > { %p1007_p0 = scmp.ge.f32.partialorder %s1346_s9, %s2370_s6 }
 0xdf4   : > { %s2454_s7 = smov (!%p1007_p0, %s967_s7), %s2452_s8 }
 0xdf5   : > { %s1014_s11 = sor.u32 2, %s2454_s7  ;;  %s1013_s1 = sor.u32 1, %s2454_s7 }
 0xdf6   : > { %v1029_v33 = vstv %s1014_s11  ;;  %v1016_v34 = vstv %s1013_s1  ;;  %s1015_s19 = sor.u32 3, %s2454_s7 }
 0xdf7   : > { %vm1030_vm4 = vcmp.ge.s32.totalorder %v1820_v38, %v1029_v33  ;;  %vm1017_vm5 = vcmp.ge.s32.totalorder %v1820_v38, %v1016_v34  ;;  %v1042_v35 = vstv %s1015_s19 }
 0xdf8   : > { %v1031_v36 = vsel %vm1030_vm4, 1.0, %v1587_v39  ;;  %v1018_v37 = vsel %vm1017_vm5, 1.0, %v1587_v39  ;;  %vm1043_vm6 = vcmp.ge.s32.totalorder %v1820_v38, %v1042_v35 }
 0xdf9   : > { %v1032_v40 = vsel %vm264_vm0, %v1031_v36, 0.0  ;;  %v1019_v41 = vsel %vm264_vm0, %v1018_v37, 0.0  ;;  %v1044_v42 = vsel %vm1043_vm6, 1.0, %v1587_v39 }
 0xdfa   : > { %1033 = vadd.xlane.f32.xlu0 %v1032_v40  ;;  %1020 = vadd.xlane.f32.xlu1 %v1019_v41  ;;  %v1045_v43 = vsel %vm264_vm0, %v1044_v42, 0.0 }
 0xdfe   : > { %1046 = vadd.xlane.f32.xlu1 %v1045_v43 }
 0xe83   : > { %v1034_v44 = vpop.xlane.xlu0 %1033  ;;  %v1021_v45 = vpop.xlane.xlu1 %1020 }
 0xe84   : > { %v1035_v46 = vrot.slane %v1034_v44, 4  ;;  %v1022_v47 = vrot.slane %v1021_v45, 4 }
 0xe86   : > { %v1036_v48 = vadd.f32 %v1035_v46, %v1034_v44  ;;  %v1023_v49 = vadd.f32 %v1022_v47, %v1021_v45 }
 0xe87   : > { %v1047_v50 = vpop.xlane.xlu1 %1046 }
 0xe88   : > { %v1037_v51 = vrot.slane %v1036_v48, 2  ;;  %v1024_v52 = vrot.slane %v1023_v49, 2  ;;  %v1048_v53 = vrot.slane %v1047_v50, 4 }
 0xe8a   : > { %v1049_v54 = vadd.f32 %v1048_v53, %v1047_v50  ;;  %v1025_v55 = vadd.f32 %v1024_v52, %v1023_v49  ;;  %v1038_v56 = vadd.f32 %v1037_v51, %v1036_v48 }
 0xe8c   : > { %v1050_v57 = vrot.slane %v1049_v54, 2  ;;  %v1026_v58 = vrot.slane %v1025_v55, 1  ;;  %v1039_v59 = vrot.slane %v1038_v56, 1 }
 0xe8e   : > { %v1027_v60 = vadd.f32 %v1026_v58, %v1025_v55  ;;  %v1040_v61 = vadd.f32 %v1039_v59, %v1038_v56  ;;  %v1051_v62 = vadd.f32 %v1050_v57, %v1049_v54 }
 0xe90   : > { %1347 = vpush %v1027_v60  ;;  %v1052_v63 = vrot.slane %v1051_v62, 1 }
 0xe91   : > { %1349 = vpush %v1040_v61 }
 0xe92   : > { %v1053_v0 = vadd.f32 %v1052_v63, %v1051_v62 }
 0xe94   : > { %1351 = vpush %v1053_v0 }
 0xec1   : > { %s1348_s30 = spop %1347 }
 0xec2   : > { %p1057_p11 = scmp.ge.f32.partialorder %s1348_s30, %s2370_s6  ;;  %s1350_s26 = spop %1349 }
 0xec3   : > { %p1056_p12 = scmp.ge.f32.partialorder %s1350_s26, %s2370_s6 }
 0xec4   : > { %s2456_s1 = smov (!%p1057_p11, %s1013_s1), %s2454_s7 }
 0xec5   : > { %s1352_s27 = spop %1351  ;;  %s2458_s11 = smov (!%p1056_p12, %s1014_s11), %s2456_s1 }
 0xec6   : > { %p1055_p4 = scmp.ge.f32.partialorder %s1352_s27, %s2370_s6 }
 0xec8   : > { %s2460_s19 = smov (!%p1055_p4, %s1015_s19), %s2458_s11 }
 0xec9   : > { %v1061_v1 = vstv %s2460_s19 }
 0xeca   : > { %vm1074_vm7 = vcmp.gt.s32.totalorder %v1820_v38, %v1061_v1  ;;  %vm1062_vm8 = vcmp.eq.s32.totalorder %v1820_v38, %v1061_v1 }
 0xecb   : > { %v1075_v2 = vsel %vm1074_vm7, 1.0, %v1587_v39  ;;  %v1063_v3 = vsel %vm1062_vm8, %v1820_v38, 0.0  ;;  %v1086_v6 = vsel %vm1074_vm7, %v1820_v38, 0.0 }
 0xecc   : > { %v1076_v4 = vsel %vm264_vm0, %v1075_v2, 0.0  ;;  %v1064_v5 = vsel %vm264_vm0, %v1063_v3, -inf  ;;  %v1087_v7 = vsel %vm264_vm0, %v1086_v6, 0.0 }
 0xecd   : > { %1077 = vadd.xlane.f32.xlu1 %v1076_v4  ;;  %1065 = vmax.xlane.f32.xlu0 %v1064_v5 }
 0xed1   : > { %1088 = vadd.xlane.f32.xlu0 %v1087_v7 }
 0xf56   : > { %v1078_v9 = vpop.xlane.xlu1 %1077  ;;  %v1066_v10 = vpop.xlane.xlu0 %1065 }
 0xf57   : > { %v1079_v11 = vrot.slane %v1078_v9, 4  ;;  %v1067_v12 = vrot.slane %v1066_v10, 4 }
 0xf59   : > { %v1080_v39 = vadd.f32 %v1079_v11, %v1078_v9  ;;  %v1068_v13 = vmax.f32 %v1066_v10, %v1067_v12 }
 0xf5a   : > { %v1089_v14 = vpop.xlane.xlu0 %1088 }
 0xf5b   : > { %v1081_v15 = vrot.slane %v1080_v39, 2  ;;  %v1069_v16 = vrot.slane %v1068_v13, 2  ;;  %v1090_v17 = vrot.slane %v1089_v14, 4 }
 0xf5d   : > { %v1082_v18 = vadd.f32 %v1081_v15, %v1080_v39  ;;  %v1091_v19 = vadd.f32 %v1090_v17, %v1089_v14  ;;  %v1070_v20 = vmax.f32 %v1068_v13, %v1069_v16 }
 0xf5f   : > { %v1092_v38 = vrot.slane %v1091_v19, 2  ;;  %v1071_v21 = vrot.slane %v1070_v20, 1  ;;  %v1083_v22 = vrot.slane %v1082_v18, 1 }
 0xf61   : > { %v1093_v23 = vadd.f32 %v1092_v38, %v1091_v19  ;;  %v1072_v24 = vmax.f32 %v1070_v20, %v1071_v21  ;;  %v1084_v25 = vadd.f32 %v1083_v22, %v1082_v18 }
 0xf63   : > { %1353 = vpush %v1072_v24  ;;  %v1094_v26 = vrot.slane %v1093_v23, 1 }
 0xf64   : > { %1355 = vpush %v1084_v25 }
 0xf65   : > { %v1095_v28 = vadd.f32 %v1094_v26, %v1093_v23 }
 0xf67   : > { %1357 = vpush %v1095_v28 }
 0xf68   : > { %1359 = vpush %v1426_v27 }
 0xf94   : > { %s1354_s17 = spop %1353 }
 0xf95   : > { %s1356_s20 = spop %1355 }
 0xf96   : > { %s1097_s10 = ssub.f32 %s2370_s6, %s1356_s20 }
 0xf98   : > { %s1358_s28 = spop %1357  ;;  %s1098_s8 = smul.f32 %s1354_s17, %s1097_s10 }
 0xf99   : > { %s1360_s25 = spop %1359 }
 0xf9a   : > { %s1099_s7 = sadd.f32 %s1358_s28, %s1098_s8 }
 0xf9c   : > { %s1103_s4 = smul.f32 %s1360_s25, %s1099_s7 }
 0xf9e   : > { %s1104_s22 = sadd.f32 %s1103_s4, %s1808_s29 }
 0xfa0   : > { %v1105_v29 = vstv %s1104_s22 }
 0xfa1   : > { %1106 = vst [vmem:[%s1811_s5] sm:$0x1] %v1105_v29 }
 0xfa2 PF: > { %1109 = sbr.rel (%p1800_p10) target bundleno = 4009 (0xfa9), region = 52 }
 0xfa7   : > { %v1110_v30 = vstv %s1808_s29 }
 0xfa8   : > { %1111 = vst [vmem:[%s1811_s5] sm:$0x1] %v1110_v30 }
 0xfa9 PF: > { %s1248_s6 = sshll.u32 %s1630_s16, 4  ;;  %s1125_s19 = sshll.u32 %s1811_s5, 4  ;;  %s1126_s19 = int_to_ptr.vmem [resolvable:$true] %s1125_s19 }
 0xfaa   : > { %s1123_s1 = scalar_lea.hbm %s2337_s3, %s1248_s6  ;;  %s1113_s30 = scalar_lea.sflag [#allocation4], %s1762_s0 }
 0xfab   : > { %s1511_s26 = scalar_lea.vmem %s1126_s19, 16  ;;  %p2357_p10 = scmp.ne.s32.totalorder %s2345_s23, 0 }
 0xfac   : > { %p1512_p5 = scmp.ne.s32.totalorder %s1126_s19, %s1511_s26  ;;  %s1588_s21 = smov [#allocation8]  }
 0xfad   : > { %s1515_s29 = sshll.u32 %s1588_s21, 4  ;;  %s1516_s29 = int_to_ptr.vmem [resolvable:$false] %s1515_s29 }
 0xfae   : > { %p1513_p7 = pnand %p1512_p5, %p2357_p10  ;;  %s1517_s27 = scalar_lea.vmem %s1516_s29, 32 }
 0xfaf   : > { %p1518_p13 = scmp.lt.s32.totalorder %s1126_s19, %s1516_s29  ;;  %p1519_p6 = scmp.lt.s32.totalorder %s1517_s27, %s1511_s26 }
 0xfb0   : > { %p1514_p2 = pneg %p1513_p7 }
 0xfb1   : > { %p1520_p8 = por %p1519_p6, %p1518_p13 }
 0xfb3   : > { %p1521_p1 = pnand %p1520_p8, %p1514_p2 }
 0xfb5   : > { %1524 = shalt.err (!%p1521_p1)
}
 0xfb6   : > { %s1525_s16 = scalar_lea.hbm %s1123_s1, 16  ;;  %s1529_s17 = scalar_lea.hbm %s2337_s3, 32 }
 0xfb7   : > { %p1526_p3 = scmp.ne.s32.totalorder %s1123_s1, %s1525_s16  ;;  %p1530_p11 = scmp.lt.s32.totalorder %s1123_s1, %s2337_s3 }
 0xfb8   : > { %p1531_p12 = scmp.lt.s32.totalorder %s1529_s17, %s1525_s16 }
 0xfb9   : > { %p1527_p9 = pnand %p1526_p3, %p2357_p10 }
 0xfba   : > { %p1532_p4 = por %p1531_p12, %p1530_p11 }
 0xfbb   : > { %p1528_p0 = pneg %p1527_p9 }
 0xfbd   : > { %p1533_p5 = pnand %p1532_p4, %p1528_p0 }
 0xfbf   : > { %1536 = shalt.err (!%p1533_p5)
}
 0xfc0   : > { %1367 = dma.vmem_to_hbm [thread:$0]  (%p2357_p10), %s1126_s19, 16, %s1123_s1, %s1113_s30  }
 0xfc1 PF: > { %s1137_s28 = sand.u32 1, %s1567_s12   ;;  %p2358_p7 = scmp.ne.s32.totalorder %s2346_s24, 0 }
 0xfc2   : > { %p2359_p2 = scmp.ge.s32.totalorder %s1579_s15, 2  ;;  %s1138_s8 = scalar_lea.sflag [#allocation4], %s1137_s28 }
 0xfc4   : > { %p1380_p13 = pnand %p2359_p2, %p2358_p7 }
 0xfc6   : > { %p1381_p6 = pneg %p1380_p13 }
 0xfc8   : > { %1562 = dma.done.wait (%p1381_p6), %s1138_s8, 16  }
 0xfc9   : > { %1564 = vsyncadd (%p1381_p6), %s1138_s8, 4294967280  ;;  %s2360_s25 = sld [smem:[#allocation12_spill]]  ;;  %p19_p8 = scmp.ge.s32.totalorder %s1634_s18, 4  }
 0xfca   : > { %s2361_s12 = smov %s1571_s13  ;;  %s2362_s13 = smov %s1575_s14 }
 0xfcb   : > { %s2364_s15 = smov %s1634_s18  ;;  %21 = sbr.rel (!%p19_p8) target bundleno = 10 (0xa), region = 109 }
 0xfcf   : > { %s2363_s14 = smov %s2360_s25 }
 0xfd0   :  { %1142 = vsyncpa [#allocation3], 1 }
 0xfd1   :  { %1144 = vsyncpa [#allocation3 + $0x1], 1 }
 0xfd2   :  { %1145 = vsyncpa [#allocation6], 1 }
 0xfd3   :  { %1147 = vsyncpa [#allocation6 + $0x1], 1 }
 0xfd4   :  { %1148 = vsyncpa [#allocation4], 1 }
 0xfd5   :  { %1150 = vsyncpa [#allocation4 + $0x1], 1 }

</bundles_post_ra>
